<compile_context>
chip_gen: v6e
topology: v6e:2x2x1
jax: 0.10.0
libtpu: 0.0.40
codegen_flags: <defaults>
</compile_context>

<pallas_src>
import jax
import jax.numpy as jnp
from jax.experimental import pallas as pl
from jax.experimental.pallas import tpu as pltpu


def _m_chunk(m, target=512):
    """Row-tile for the hoisted projection (multiple of 8 sublanes, or full)."""
    if m <= target:
        return m
    for c in range(target - (target % 8), 7, -8):
        if m % c == 0:
            return c
    return m


def _time_chunk(t, target=32):
    """Timesteps per grid step of the recurrence (multiple of 8, or full)."""
    if t <= target:
        return t
    for c in range(target - (target % 8), 7, -8):
        if t % c == 0:
            return c
    return t


# ---------------------------------------------------------------------------
# Phase 1: fused input projections + neuromod gate (fully parallel over B*T).
# ---------------------------------------------------------------------------
def _gru_proj_kernel(x_ref, w_cat_ref, b_cat_ref, gi_ref, gate_ref):
    x = x_ref[...].astype(jnp.float32)                               # (TM, E)
    slab = jnp.dot(x, w_cat_ref[...].astype(jnp.float32),
                   preferred_element_type=jnp.float32)               # (TM, 3H+E)
    slab = slab + b_cat_ref[...].astype(jnp.float32)
    h3 = gi_ref.shape[-1]                                            # 3H
    gi_ref[...] = slab[:, :h3].astype(gi_ref.dtype)
    gate_ref[...] = jax.nn.sigmoid(slab[:, h3:]).astype(gate_ref.dtype)


# ---------------------------------------------------------------------------
# Phase 2: serial GRU recurrence over time chunks (only h-dependent work).
# ---------------------------------------------------------------------------
def _gru_recurrence_kernel(gi_ref, gate_ref, h0_ref, w_hh_ref, b_hhn_ref,
                           out_ref, hN_ref, h_scratch):
    @pl.when(pl.program_id(0) == 0)
    def _():
        h_scratch[...] = h0_ref[...].astype(jnp.float32)

    h = h_scratch[...]                                               # (B, H) f32
    b_hh_n = b_hhn_ref[...].astype(jnp.float32)                      # (1, H)
    TT = out_ref.shape[1]
    H = out_ref.shape[2]

    # Statically unrolled inner loop over the TT timesteps of this chunk.
    for tt in range(TT):
        gh = jnp.dot(h, w_hh_ref[...].astype(jnp.float32),
                     preferred_element_type=jnp.float32)             # (B, 3H)
        # gi already contains b_ih (all gates) + b_hh (r, z) folded in Phase 1.
        gx = gi_ref[:, tt, :].astype(jnp.float32)                    # (B, 3H)
        rz = jax.nn.sigmoid(gx[:, :2 * H] + gh[:, :2 * H])
        r = rz[:, :H]
        z = rz[:, H:]
        n = jnp.tanh(gx[:, 2 * H:] + r * (gh[:, 2 * H:] + b_hh_n))
        h = (1.0 - z) * n + z * h
        out_ref[:, tt, :] = (h * gate_ref[:, tt, :].astype(jnp.float32)
                             ).astype(out_ref.dtype)

    h_scratch[...] = h
    hN_ref[...] = h.astype(hN_ref.dtype)


# ---------------------------------------------------------------------------
# Wrapper (batch-first layout in and out, like the PyTorch module).
# ---------------------------------------------------------------------------
def feedback_rnn(x, h0, params, *, time_chunk=None):
    """x: [B, T, E] batch-first.  Returns (out * gate [B, T, H], hidden [1, B, H])."""
    B, T, E = x.shape
    H = params["w_hh"].shape[-1]
    assert h0.shape == (B, H)
    # out * gate requires hidden_size == n_embd (PyTorch module default).
    assert H == E, "FeedbackRNN requires hidden_size == n_embd for the gated output"

    f32 = jnp.float32
    w_ih = params["w_ih"].astype(f32)            # (3, E, H)
    w_hh = params["w_hh"].astype(f32)            # (3, H, H)
    b_ih = params["b_ih"].astype(f32)            # (3, H)
    b_hh = params["b_hh"].astype(f32)            # (3, H)
    w_mod = params["w_mod"].astype(f32)          # (E, E)
    b_mod = params["b_mod"].astype(f32)          # (1, E)

    # Fused projection weight [W_ir | W_iz | W_in | W_mod] -> (E, 3H+E).
    w_cat = jnp.concatenate([w_ih[0], w_ih[1], w_ih[2], w_mod], axis=1)
    # Fold the hidden bias of r/z into the input-side bias (the n-gate hidden
    # bias stays separate because it is multiplied by r).
    b_cat = jnp.concatenate(
        [b_ih[0] + b_hh[0], b_ih[1] + b_hh[1], b_ih[2], b_mod[0]])[None, :]
    w_hh_cat = jnp.concatenate([w_hh[0], w_hh[1], w_hh[2]], axis=1)   # (H, 3H)
    b_hh_n = b_hh[2][None, :]                                          # (1, H)

    # ---- Phase 1: one wide matmul over M = B*T rows. ----
    M = B * T
    TM = _m_chunk(M)
    x_flat = x.reshape(M, E)                     # contiguous reshape

    gi_flat, gate_flat = pl.pallas_call(
        _gru_proj_kernel,
        out_shape=(jax.ShapeDtypeStruct((M, 3 * H), f32),
                   jax.ShapeDtypeStruct((M, E), f32)),
        grid_spec=pltpu.PrefetchScalarGridSpec(
            num_scalar_prefetch=0,
            grid=(M // TM,),
            in_specs=[
                pl.BlockSpec((TM, E), lambda i: (i, 0)),              # x rows
                pl.BlockSpec((E, 3 * H + E), lambda i: (0, 0)),       # fused W
                pl.BlockSpec((1, 3 * H + E), lambda i: (0, 0)),       # fused bias
            ],
            out_specs=[
                pl.BlockSpec((TM, 3 * H), lambda i: (i, 0)),          # gi
                pl.BlockSpec((TM, E), lambda i: (i, 0)),              # gate
            ],
        ),
        compiler_params=pltpu.CompilerParams(
            dimension_semantics=("parallel",)),
    )(x_flat, w_cat, b_cat)

    gi = gi_flat.reshape(B, T, 3 * H)            # contiguous reshape
    gate = gate_flat.reshape(B, T, E)

    # ---- Phase 2: serial recurrence over time chunks. ----
    TT = time_chunk or _time_chunk(T)
    assert T % TT == 0

    out, hN = pl.pallas_call(
        _gru_recurrence_kernel,
        out_shape=(jax.ShapeDtypeStruct((B, T, H), x.dtype),
                   jax.ShapeDtypeStruct((B, H), x.dtype)),
        grid_spec=pltpu.PrefetchScalarGridSpec(
            num_scalar_prefetch=0,
            grid=(T // TT,),
            in_specs=[
                pl.BlockSpec((B, TT, 3 * H), lambda i: (0, i, 0)),    # gi chunk
                pl.BlockSpec((B, TT, E), lambda i: (0, i, 0)),        # gate chunk
                pl.BlockSpec((B, H), lambda i: (0, 0)),               # h0
                pl.BlockSpec((H, 3 * H), lambda i: (0, 0)),           # W_hh fused
                pl.BlockSpec((1, H), lambda i: (0, 0)),               # b_hh (n gate)
            ],
            out_specs=[
                pl.BlockSpec((B, TT, H), lambda i: (0, i, 0)),        # gated out
                pl.BlockSpec((B, H), lambda i: (0, 0)),               # final hidden
            ],
            scratch_shapes=[pltpu.VMEM((B, H), jnp.float32)],
        ),
        compiler_params=pltpu.CompilerParams(
            dimension_semantics=("arbitrary",)),                      # sequential
    )(gi, gate, h0.astype(f32), w_hh_cat, b_hh_n)

    return out, hN[None]                          # hidden as (1, B, H) like PyTorch


# ---------------------------------------------------------------------------
# Pure-JAX reference (PyTorch GRU semantics, gate order r, z, n).
# ---------------------------------------------------------------------------
def feedback_rnn_ref(x, h0, params):
    w_ih, w_hh = params["w_ih"], params["w_hh"]
    b_ih, b_hh = params["b_ih"], params["b_hh"]

    def step(h, x_t):
        gi = [x_t @ w_ih[g] + b_ih[g] for g in range(3)]
        gh = [h @ w_hh[g] + b_hh[g] for g in range(3)]
        r = jax.nn.sigmoid(gi[0] + gh[0])
        z = jax.nn.sigmoid(gi[1] + gh[1])
        n = jnp.tanh(gi[2] + r * gh[2])
        h_new = (1.0 - z) * n + z * h
        return h_new, h_new

    hN, outs = jax.lax.scan(step, h0, jnp.transpose(x, (1, 0, 2)))
    out = jnp.transpose(outs, (1, 0, 2))
    gate = jax.nn.sigmoid(x @ params["w_mod"] + params["b_mod"][0])
    return out * gate, hN[None]


def init_params(key, n_embd, hidden_size):
    """Deterministic synthetic init (PyTorch-style uniform(-1/sqrt(H), 1/sqrt(H)))."""
    E, H = n_embd, hidden_size
    ks = jax.random.split(key, 6)
    s = 1.0 / (H ** 0.5)
    u = lambda k, shape, scale: jax.random.uniform(k, shape, jnp.float32, -scale, scale)
    return {
        "w_ih": u(ks[0], (3, E, H), s),          # per-gate transposed weight_ih_l0
        "w_hh": u(ks[1], (3, H, H), s),          # per-gate transposed weight_hh_l0
        "b_ih": u(ks[2], (3, H), s),
        "b_hh": u(ks[3], (3, H), s),
        "w_mod": u(ks[4], (E, E), 1.0 / (E ** 0.5)),   # transposed Linear weight
        "b_mod": u(ks[5], (1, E), 1.0 / (E ** 0.5)),
    }


if __name__ == "__main__":
    B, T, E = 2, 8, 32
    H = E  # hidden_size defaults to n_embd (required for out * gate broadcast)

    key = jax.random.PRNGKey(0)
    kx, kp = jax.random.split(key, 2)
    x = jax.random.normal(kx, (B, T, E), jnp.float32)
    h0 = jnp.zeros((B, H), jnp.float32)          # PyTorch GRU default initial hidden
    params = init_params(kp, E, H)

    out, hidden = jax.jit(feedback_rnn)(x, h0, params)
    out = jax.block_until_ready(out)
    hidden = jax.block_until_ready(hidden)

    out_ref, hidden_ref = feedback_rnn_ref(x, h0, params)
    assert out.shape == (B, T, H) and hidden.shape == (1, B, H)
    assert jnp.allclose(out, out_ref, atol=2e-5, rtol=2e-5)
    assert jnp.allclose(hidden, hidden_ref, atol=2e-5, rtol=2e-5)

    print("KERNEL_OK")
</pallas_src>

<mosaic_0001>
module attributes {stable_mosaic.version = 11 : i64} {
  func.func @_gru_proj_kernel(%arg0: i32, %arg1: memref<16x32xf32, #tpu.memory_space<vmem>>, %arg2: memref<32x128xf32, #tpu.memory_space<vmem>>, %arg3: memref<1x128xf32, #tpu.memory_space<vmem>>, %arg4: memref<16x96xf32, #tpu.memory_space<vmem>>, %arg5: memref<16x32xf32, #tpu.memory_space<vmem>>) attributes {dimension_semantics = [#tpu.dimension_semantics<parallel>], iteration_bounds = array<i64: 1>, scalar_prefetch = 0 : i64, scratch_operands = 0 : i64, tpu.core_type = #tpu.core_type<tc>, window_params = [{transform_indices = @transform_0, window_bounds = array<i64: 16, 32>}, {pipeline_mode = #tpu.pipeline_mode<synchronous>, transform_indices = @transform_1, window_bounds = array<i64: 32, 128>}, {pipeline_mode = #tpu.pipeline_mode<synchronous>, transform_indices = @transform_2, window_bounds = array<i64: 1, 128>}, {transform_indices = @transform_3, window_bounds = array<i64: 16, 96>}, {transform_indices = @transform_4, window_bounds = array<i64: 16, 32>}]} {
    %c0 = arith.constant 0 : index
    %c0_0 = arith.constant 0 : index
    %0 = vector.load %arg1[%c0, %c0_0] : memref<16x32xf32, #tpu.memory_space<vmem>>, vector<16x32xf32>
    %c0_1 = arith.constant 0 : index
    %c0_2 = arith.constant 0 : index
    %1 = vector.load %arg2[%c0_1, %c0_2] : memref<32x128xf32, #tpu.memory_space<vmem>>, vector<32x128xf32>
    %cst = arith.constant dense<0.000000e+00> : vector<16x128xf32>
    %2 = tpu.matmul %0, %1, %cst {dimension_numbers = #tpu.dot_dimension_numbers<[1], [0], [0], [1], [0, 0, 1, 1], [], []>} : vector<16x32xf32>, vector<32x128xf32>, vector<16x128xf32> -> vector<16x128xf32>
    %c0_3 = arith.constant 0 : index
    %c0_4 = arith.constant 0 : index
    %3 = vector.load %arg3[%c0_3, %c0_4] : memref<1x128xf32, #tpu.memory_space<vmem>>, vector<1x128xf32>
    %4 = vector.broadcast %3 : vector<1x128xf32> to vector<16x128xf32>
    %5 = arith.addf %2, %4 : vector<16x128xf32>
    %6 = vector.extract_strided_slice %5 {offsets = [0, 0], sizes = [16, 96], strides = [1, 1]} : vector<16x128xf32> to vector<16x96xf32>
    %c0_5 = arith.constant 0 : index
    %c0_6 = arith.constant 0 : index
    %7 = vector.load %arg4[%c0_5, %c0_6] : memref<16x96xf32, #tpu.memory_space<vmem>>, vector<16x96xf32>
    tpu.vector_store %arg4[%c0_5, %c0_6], %6 {strides = array<i32>} : memref<16x96xf32, #tpu.memory_space<vmem>>, vector<16x96xf32>,
    %8 = vector.extract_strided_slice %5 {offsets = [0, 96], sizes = [16, 32], strides = [1, 1]} : vector<16x128xf32> to vector<16x32xf32>
    %9 = arith.negf %8 : vector<16x32xf32>
    %10 = math.exp %9 : vector<16x32xf32>
    %cst_7 = arith.constant 1.000000e+00 : f32
    %11 = vector.broadcast %cst_7 : f32 to vector<16x32xf32>
    %12 = arith.addf %11, %10 : vector<16x32xf32>
    %13 = arith.divf %11, %12 : vector<16x32xf32>
    %c0_8 = arith.constant 0 : index
    %c0_9 = arith.constant 0 : index
    %14 = vector.load %arg5[%c0_8, %c0_9] : memref<16x32xf32, #tpu.memory_space<vmem>>, vector<16x32xf32>
    tpu.vector_store %arg5[%c0_8, %c0_9], %13 {strides = array<i32>} : memref<16x32xf32, #tpu.memory_space<vmem>>, vector<16x32xf32>,
    return
  }
  func.func @transform_0(%arg0: i32) -> (i32, i32) {
    %c0_i32 = arith.constant 0 : i32
    %c0_i32_0 = arith.constant 0 : i32
    return %arg0, %c0_i32 : i32, i32
  }
  func.func @transform_1(%arg0: i32) -> (i32, i32) {
    %c0_i32 = arith.constant 0 : i32
    %c0_i32_0 = arith.constant 0 : i32
    %c0_i32_1 = arith.constant 0 : i32
    return %c0_i32, %c0_i32_0 : i32, i32
  }
  func.func @transform_2(%arg0: i32) -> (i32, i32) {
    %c0_i32 = arith.constant 0 : i32
    %c0_i32_0 = arith.constant 0 : i32
    %c0_i32_1 = arith.constant 0 : i32
    return %c0_i32, %c0_i32_0 : i32, i32
  }
  func.func @transform_3(%arg0: i32) -> (i32, i32) {
    %c0_i32 = arith.constant 0 : i32
    %c0_i32_0 = arith.constant 0 : i32
    return %arg0, %c0_i32 : i32, i32
  }
  func.func @transform_4(%arg0: i32) -> (i32, i32) {
    %c0_i32 = arith.constant 0 : i32
    %c0_i32_0 = arith.constant 0 : i32
    return %arg0, %c0_i32 : i32, i32
  }
}

module attributes {stable_mosaic.version = 11 : i64} {
  func.func @_gru_recurrence_kernel(%arg0: i32, %arg1: memref<2x8x96xf32, #tpu.memory_space<vmem>>, %arg2: memref<2x8x32xf32, #tpu.memory_space<vmem>>, %arg3: memref<2x32xf32, #tpu.memory_space<vmem>>, %arg4: memref<32x96xf32, #tpu.memory_space<vmem>>, %arg5: memref<1x32xf32, #tpu.memory_space<vmem>>, %arg6: memref<2x8x32xf32, #tpu.memory_space<vmem>>, %arg7: memref<2x32xf32, #tpu.memory_space<vmem>>, %arg8: memref<2x32xf32, #tpu.memory_space<vmem>>) attributes {dimension_semantics = [#tpu.dimension_semantics<arbitrary>], iteration_bounds = array<i64: 1>, scalar_prefetch = 0 : i64, scratch_operands = 1 : i64, tpu.core_type = #tpu.core_type<tc>, window_params = [{transform_indices = @transform_0, window_bounds = array<i64: 2, 8, 96>}, {transform_indices = @transform_1, window_bounds = array<i64: 2, 8, 32>}, {pipeline_mode = #tpu.pipeline_mode<synchronous>, transform_indices = @transform_2, window_bounds = array<i64: 2, 32>}, {pipeline_mode = #tpu.pipeline_mode<synchronous>, transform_indices = @transform_3, window_bounds = array<i64: 32, 96>}, {pipeline_mode = #tpu.pipeline_mode<synchronous>, transform_indices = @transform_4, window_bounds = array<i64: 1, 32>}, {transform_indices = @transform_5, window_bounds = array<i64: 2, 8, 32>}, {pipeline_mode = #tpu.pipeline_mode<synchronous>, transform_indices = @transform_6, window_bounds = array<i64: 2, 32>}]} {
    %c0_i32 = arith.constant 0 : i32
    %0 = arith.cmpi eq, %arg0, %c0_i32 : i32
    %1 = arith.extui %0 : i1 to i32
    %c0_i32_0 = arith.constant 0 : i32
    %2 = arith.cmpi ne, %1, %c0_i32_0 : i32
    scf.if %2 {
      %c0_112 = arith.constant 0 : index
      %c0_113 = arith.constant 0 : index
      %263 = vector.load %arg3[%c0_112, %c0_113] : memref<2x32xf32, #tpu.memory_space<vmem>>, vector<2x32xf32>
      %c0_114 = arith.constant 0 : index
      %c0_115 = arith.constant 0 : index
      %264 = vector.load %arg8[%c0_114, %c0_115] : memref<2x32xf32, #tpu.memory_space<vmem>>, vector<2x32xf32>
      tpu.vector_store %arg8[%c0_114, %c0_115], %263 {strides = array<i32>} : memref<2x32xf32, #tpu.memory_space<vmem>>, vector<2x32xf32>,
    } else {
    }
    %c0 = arith.constant 0 : index
    %c0_1 = arith.constant 0 : index
    %3 = vector.load %arg8[%c0, %c0_1] : memref<2x32xf32, #tpu.memory_space<vmem>>, vector<2x32xf32>
    %c0_2 = arith.constant 0 : index
    %c0_3 = arith.constant 0 : index
    %4 = vector.load %arg5[%c0_2, %c0_3] : memref<1x32xf32, #tpu.memory_space<vmem>>, vector<1x32xf32>
    %c0_4 = arith.constant 0 : index
    %c0_5 = arith.constant 0 : index
    %5 = vector.load %arg4[%c0_4, %c0_5] : memref<32x96xf32, #tpu.memory_space<vmem>>, vector<32x96xf32>
    %cst = arith.constant dense<0.000000e+00> : vector<2x96xf32>
    %6 = tpu.matmul %3, %5, %cst {dimension_numbers = #tpu.dot_dimension_numbers<[1], [0], [0], [1], [0, 0, 1, 1], [], []>} : vector<2x32xf32>, vector<32x96xf32>, vector<2x96xf32> -> vector<2x96xf32>
    %c0_6 = arith.constant 0 : index
    %c0_7 = arith.constant 0 : index
    %c0_8 = arith.constant 0 : index
    %7 = vector.load %arg1[%c0_6, %c0_7, %c0_8] : memref<2x8x96xf32, #tpu.memory_space<vmem>>, vector<2x1x96xf32>
    %8 = vector.shape_cast %7 : vector<2x1x96xf32> to vector<2x96xf32>
    %9 = vector.extract_strided_slice %8 {offsets = [0, 0], sizes = [2, 64], strides = [1, 1]} : vector<2x96xf32> to vector<2x64xf32>
    %10 = vector.extract_strided_slice %6 {offsets = [0, 0], sizes = [2, 64], strides = [1, 1]} : vector<2x96xf32> to vector<2x64xf32>
    %11 = arith.addf %9, %10 : vector<2x64xf32>
    %12 = arith.negf %11 : vector<2x64xf32>
    %13 = math.exp %12 : vector<2x64xf32>
    %cst_9 = arith.constant 1.000000e+00 : f32
    %14 = vector.broadcast %cst_9 : f32 to vector<2x64xf32>
    %15 = arith.addf %14, %13 : vector<2x64xf32>
    %16 = arith.divf %14, %15 : vector<2x64xf32>
    %17 = vector.extract_strided_slice %16 {offsets = [0, 0], sizes = [2, 32], strides = [1, 1]} : vector<2x64xf32> to vector<2x32xf32>
    %18 = vector.extract_strided_slice %16 {offsets = [0, 32], sizes = [2, 32], strides = [1, 1]} : vector<2x64xf32> to vector<2x32xf32>
    %19 = vector.extract_strided_slice %8 {offsets = [0, 64], sizes = [2, 32], strides = [1, 1]} : vector<2x96xf32> to vector<2x32xf32>
    %20 = vector.extract_strided_slice %6 {offsets = [0, 64], sizes = [2, 32], strides = [1, 1]} : vector<2x96xf32> to vector<2x32xf32>
    %21 = vector.broadcast %4 : vector<1x32xf32> to vector<2x32xf32>
    %22 = arith.addf %20, %21 : vector<2x32xf32>
    %23 = arith.mulf %17, %22 : vector<2x32xf32>
    %24 = arith.addf %19, %23 : vector<2x32xf32>
    %25 = math.tanh %24 : vector<2x32xf32>
    %cst_10 = arith.constant 1.000000e+00 : f32
    %26 = vector.broadcast %cst_10 : f32 to vector<2x32xf32>
    %27 = arith.subf %26, %18 : vector<2x32xf32>
    %28 = arith.mulf %27, %25 : vector<2x32xf32>
    %29 = arith.mulf %18, %3 : vector<2x32xf32>
    %30 = arith.addf %28, %29 : vector<2x32xf32>
    %c0_11 = arith.constant 0 : index
    %c0_12 = arith.constant 0 : index
    %c0_13 = arith.constant 0 : index
    %31 = vector.load %arg2[%c0_11, %c0_12, %c0_13] : memref<2x8x32xf32, #tpu.memory_space<vmem>>, vector<2x1x32xf32>
    %32 = vector.shape_cast %31 : vector<2x1x32xf32> to vector<2x32xf32>
    %33 = arith.mulf %30, %32 : vector<2x32xf32>
    %c0_14 = arith.constant 0 : index
    %c0_15 = arith.constant 0 : index
    %c0_16 = arith.constant 0 : index
    %34 = vector.load %arg6[%c0_14, %c0_15, %c0_16] : memref<2x8x32xf32, #tpu.memory_space<vmem>>, vector<2x1x32xf32>
    %35 = vector.shape_cast %34 : vector<2x1x32xf32> to vector<2x32xf32>
    %36 = vector.shape_cast %33 : vector<2x32xf32> to vector<2x1x32xf32>
    tpu.vector_store %arg6[%c0_14, %c0_15, %c0_16], %36 {strides = array<i32>} : memref<2x8x32xf32, #tpu.memory_space<vmem>>, vector<2x1x32xf32>,
    %c0_17 = arith.constant 0 : index
    %c0_18 = arith.constant 0 : index
    %37 = vector.load %arg4[%c0_17, %c0_18] : memref<32x96xf32, #tpu.memory_space<vmem>>, vector<32x96xf32>
    %cst_19 = arith.constant dense<0.000000e+00> : vector<2x96xf32>
    %38 = tpu.matmul %30, %37, %cst_19 {dimension_numbers = #tpu.dot_dimension_numbers<[1], [0], [0], [1], [0, 0, 1, 1], [], []>} : vector<2x32xf32>, vector<32x96xf32>, vector<2x96xf32> -> vector<2x96xf32>
    %c0_20 = arith.constant 0 : index
    %c1 = arith.constant 1 : index
    %c0_21 = arith.constant 0 : index
    %39 = vector.load %arg1[%c0_20, %c1, %c0_21] : memref<2x8x96xf32, #tpu.memory_space<vmem>>, vector<2x1x96xf32>
    %40 = vector.shape_cast %39 : vector<2x1x96xf32> to vector<2x96xf32>
    %41 = vector.extract_strided_slice %40 {offsets = [0, 0], sizes = [2, 64], strides = [1, 1]} : vector<2x96xf32> to vector<2x64xf32>
    %42 = vector.extract_strided_slice %38 {offsets = [0, 0], sizes = [2, 64], strides = [1, 1]} : vector<2x96xf32> to vector<2x64xf32>
    %43 = arith.addf %41, %42 : vector<2x64xf32>
    %44 = arith.negf %43 : vector<2x64xf32>
    %45 = math.exp %44 : vector<2x64xf32>
    %cst_22 = arith.constant 1.000000e+00 : f32
    %46 = vector.broadcast %cst_22 : f32 to vector<2x64xf32>
    %47 = arith.addf %46, %45 : vector<2x64xf32>
    %48 = arith.divf %46, %47 : vector<2x64xf32>
    %49 = vector.extract_strided_slice %48 {offsets = [0, 0], sizes = [2, 32], strides = [1, 1]} : vector<2x64xf32> to vector<2x32xf32>
    %50 = vector.extract_strided_slice %48 {offsets = [0, 32], sizes = [2, 32], strides = [1, 1]} : vector<2x64xf32> to vector<2x32xf32>
    %51 = vector.extract_strided_slice %40 {offsets = [0, 64], sizes = [2, 32], strides = [1, 1]} : vector<2x96xf32> to vector<2x32xf32>
    %52 = vector.extract_strided_slice %38 {offsets = [0, 64], sizes = [2, 32], strides = [1, 1]} : vector<2x96xf32> to vector<2x32xf32>
    %53 = vector.broadcast %4 : vector<1x32xf32> to vector<2x32xf32>
    %54 = arith.addf %52, %53 : vector<2x32xf32>
    %55 = arith.mulf %49, %54 : vector<2x32xf32>
    %56 = arith.addf %51, %55 : vector<2x32xf32>
    %57 = math.tanh %56 : vector<2x32xf32>
    %cst_23 = arith.constant 1.000000e+00 : f32
    %58 = vector.broadcast %cst_23 : f32 to vector<2x32xf32>
    %59 = arith.subf %58, %50 : vector<2x32xf32>
    %60 = arith.mulf %59, %57 : vector<2x32xf32>
    %61 = arith.mulf %50, %30 : vector<2x32xf32>
    %62 = arith.addf %60, %61 : vector<2x32xf32>
    %c0_24 = arith.constant 0 : index
    %c1_25 = arith.constant 1 : index
    %c0_26 = arith.constant 0 : index
    %63 = vector.load %arg2[%c0_24, %c1_25, %c0_26] : memref<2x8x32xf32, #tpu.memory_space<vmem>>, vector<2x1x32xf32>
    %64 = vector.shape_cast %63 : vector<2x1x32xf32> to vector<2x32xf32>
    %65 = arith.mulf %62, %64 : vector<2x32xf32>
    %c0_27 = arith.constant 0 : index
    %c1_28 = arith.constant 1 : index
    %c0_29 = arith.constant 0 : index
    %66 = vector.load %arg6[%c0_27, %c1_28, %c0_29] : memref<2x8x32xf32, #tpu.memory_space<vmem>>, vector<2x1x32xf32>
    %67 = vector.shape_cast %66 : vector<2x1x32xf32> to vector<2x32xf32>
    %68 = vector.shape_cast %65 : vector<2x32xf32> to vector<2x1x32xf32>
    tpu.vector_store %arg6[%c0_27, %c1_28, %c0_29], %68 {strides = array<i32>} : memref<2x8x32xf32, #tpu.memory_space<vmem>>, vector<2x1x32xf32>,
    %c0_30 = arith.constant 0 : index
    %c0_31 = arith.constant 0 : index
    %69 = vector.load %arg4[%c0_30, %c0_31] : memref<32x96xf32, #tpu.memory_space<vmem>>, vector<32x96xf32>
    %cst_32 = arith.constant dense<0.000000e+00> : vector<2x96xf32>
    %70 = tpu.matmul %62, %69, %cst_32 {dimension_numbers = #tpu.dot_dimension_numbers<[1], [0], [0], [1], [0, 0, 1, 1], [], []>} : vector<2x32xf32>, vector<32x96xf32>, vector<2x96xf32> -> vector<2x96xf32>
    %c0_33 = arith.constant 0 : index
    %c2 = arith.constant 2 : index
    %c0_34 = arith.constant 0 : index
    %71 = vector.load %arg1[%c0_33, %c2, %c0_34] : memref<2x8x96xf32, #tpu.memory_space<vmem>>, vector<2x1x96xf32>
    %72 = vector.shape_cast %71 : vector<2x1x96xf32> to vector<2x96xf32>
    %73 = vector.extract_strided_slice %72 {offsets = [0, 0], sizes = [2, 64], strides = [1, 1]} : vector<2x96xf32> to vector<2x64xf32>
    %74 = vector.extract_strided_slice %70 {offsets = [0, 0], sizes = [2, 64], strides = [1, 1]} : vector<2x96xf32> to vector<2x64xf32>
    %75 = arith.addf %73, %74 : vector<2x64xf32>
    %76 = arith.negf %75 : vector<2x64xf32>
    %77 = math.exp %76 : vector<2x64xf32>
    %cst_35 = arith.constant 1.000000e+00 : f32
    %78 = vector.broadcast %cst_35 : f32 to vector<2x64xf32>
    %79 = arith.addf %78, %77 : vector<2x64xf32>
    %80 = arith.divf %78, %79 : vector<2x64xf32>
    %81 = vector.extract_strided_slice %80 {offsets = [0, 0], sizes = [2, 32], strides = [1, 1]} : vector<2x64xf32> to vector<2x32xf32>
    %82 = vector.extract_strided_slice %80 {offsets = [0, 32], sizes = [2, 32], strides = [1, 1]} : vector<2x64xf32> to vector<2x32xf32>
    %83 = vector.extract_strided_slice %72 {offsets = [0, 64], sizes = [2, 32], strides = [1, 1]} : vector<2x96xf32> to vector<2x32xf32>
    %84 = vector.extract_strided_slice %70 {offsets = [0, 64], sizes = [2, 32], strides = [1, 1]} : vector<2x96xf32> to vector<2x32xf32>
    %85 = vector.broadcast %4 : vector<1x32xf32> to vector<2x32xf32>
    %86 = arith.addf %84, %85 : vector<2x32xf32>
    %87 = arith.mulf %81, %86 : vector<2x32xf32>
    %88 = arith.addf %83, %87 : vector<2x32xf32>
    %89 = math.tanh %88 : vector<2x32xf32>
    %cst_36 = arith.constant 1.000000e+00 : f32
    %90 = vector.broadcast %cst_36 : f32 to vector<2x32xf32>
    %91 = arith.subf %90, %82 : vector<2x32xf32>
    %92 = arith.mulf %91, %89 : vector<2x32xf32>
    %93 = arith.mulf %82, %62 : vector<2x32xf32>
    %94 = arith.addf %92, %93 : vector<2x32xf32>
    %c0_37 = arith.constant 0 : index
    %c2_38 = arith.constant 2 : index
    %c0_39 = arith.constant 0 : index
    %95 = vector.load %arg2[%c0_37, %c2_38, %c0_39] : memref<2x8x32xf32, #tpu.memory_space<vmem>>, vector<2x1x32xf32>
    %96 = vector.shape_cast %95 : vector<2x1x32xf32> to vector<2x32xf32>
    %97 = arith.mulf %94, %96 : vector<2x32xf32>
    %c0_40 = arith.constant 0 : index
    %c2_41 = arith.constant 2 : index
    %c0_42 = arith.constant 0 : index
    %98 = vector.load %arg6[%c0_40, %c2_41, %c0_42] : memref<2x8x32xf32, #tpu.memory_space<vmem>>, vector<2x1x32xf32>
    %99 = vector.shape_cast %98 : vector<2x1x32xf32> to vector<2x32xf32>
    %100 = vector.shape_cast %97 : vector<2x32xf32> to vector<2x1x32xf32>
    tpu.vector_store %arg6[%c0_40, %c2_41, %c0_42], %100 {strides = array<i32>} : memref<2x8x32xf32, #tpu.memory_space<vmem>>, vector<2x1x32xf32>,
    %c0_43 = arith.constant 0 : index
    %c0_44 = arith.constant 0 : index
    %101 = vector.load %arg4[%c0_43, %c0_44] : memref<32x96xf32, #tpu.memory_space<vmem>>, vector<32x96xf32>
    %cst_45 = arith.constant dense<0.000000e+00> : vector<2x96xf32>
    %102 = tpu.matmul %94, %101, %cst_45 {dimension_numbers = #tpu.dot_dimension_numbers<[1], [0], [0], [1], [0, 0, 1, 1], [], []>} : vector<2x32xf32>, vector<32x96xf32>, vector<2x96xf32> -> vector<2x96xf32>
    %c0_46 = arith.constant 0 : index
    %c3 = arith.constant 3 : index
    %c0_47 = arith.constant 0 : index
    %103 = vector.load %arg1[%c0_46, %c3, %c0_47] : memref<2x8x96xf32, #tpu.memory_space<vmem>>, vector<2x1x96xf32>
    %104 = vector.shape_cast %103 : vector<2x1x96xf32> to vector<2x96xf32>
    %105 = vector.extract_strided_slice %104 {offsets = [0, 0], sizes = [2, 64], strides = [1, 1]} : vector<2x96xf32> to vector<2x64xf32>
    %106 = vector.extract_strided_slice %102 {offsets = [0, 0], sizes = [2, 64], strides = [1, 1]} : vector<2x96xf32> to vector<2x64xf32>
    %107 = arith.addf %105, %106 : vector<2x64xf32>
    %108 = arith.negf %107 : vector<2x64xf32>
    %109 = math.exp %108 : vector<2x64xf32>
    %cst_48 = arith.constant 1.000000e+00 : f32
    %110 = vector.broadcast %cst_48 : f32 to vector<2x64xf32>
    %111 = arith.addf %110, %109 : vector<2x64xf32>
    %112 = arith.divf %110, %111 : vector<2x64xf32>
    %113 = vector.extract_strided_slice %112 {offsets = [0, 0], sizes = [2, 32], strides = [1, 1]} : vector<2x64xf32> to vector<2x32xf32>
    %114 = vector.extract_strided_slice %112 {offsets = [0, 32], sizes = [2, 32], strides = [1, 1]} : vector<2x64xf32> to vector<2x32xf32>
    %115 = vector.extract_strided_slice %104 {offsets = [0, 64], sizes = [2, 32], strides = [1, 1]} : vector<2x96xf32> to vector<2x32xf32>
    %116 = vector.extract_strided_slice %102 {offsets = [0, 64], sizes = [2, 32], strides = [1, 1]} : vector<2x96xf32> to vector<2x32xf32>
    %117 = vector.broadcast %4 : vector<1x32xf32> to vector<2x32xf32>
    %118 = arith.addf %116, %117 : vector<2x32xf32>
    %119 = arith.mulf %113, %118 : vector<2x32xf32>
    %120 = arith.addf %115, %119 : vector<2x32xf32>
    %121 = math.tanh %120 : vector<2x32xf32>
    %cst_49 = arith.constant 1.000000e+00 : f32
    %122 = vector.broadcast %cst_49 : f32 to vector<2x32xf32>
    %123 = arith.subf %122, %114 : vector<2x32xf32>
    %124 = arith.mulf %123, %121 : vector<2x32xf32>
    %125 = arith.mulf %114, %94 : vector<2x32xf32>
    %126 = arith.addf %124, %125 : vector<2x32xf32>
    %c0_50 = arith.constant 0 : index
    %c3_51 = arith.constant 3 : index
    %c0_52 = arith.constant 0 : index
    %127 = vector.load %arg2[%c0_50, %c3_51, %c0_52] : memref<2x8x32xf32, #tpu.memory_space<vmem>>, vector<2x1x32xf32>
    %128 = vector.shape_cast %127 : vector<2x1x32xf32> to vector<2x32xf32>
    %129 = arith.mulf %126, %128 : vector<2x32xf32>
    %c0_53 = arith.constant 0 : index
    %c3_54 = arith.constant 3 : index
    %c0_55 = arith.constant 0 : index
    %130 = vector.load %arg6[%c0_53, %c3_54, %c0_55] : memref<2x8x32xf32, #tpu.memory_space<vmem>>, vector<2x1x32xf32>
    %131 = vector.shape_cast %130 : vector<2x1x32xf32> to vector<2x32xf32>
    %132 = vector.shape_cast %129 : vector<2x32xf32> to vector<2x1x32xf32>
    tpu.vector_store %arg6[%c0_53, %c3_54, %c0_55], %132 {strides = array<i32>} : memref<2x8x32xf32, #tpu.memory_space<vmem>>, vector<2x1x32xf32>,
    %c0_56 = arith.constant 0 : index
    %c0_57 = arith.constant 0 : index
    %133 = vector.load %arg4[%c0_56, %c0_57] : memref<32x96xf32, #tpu.memory_space<vmem>>, vector<32x96xf32>
    %cst_58 = arith.constant dense<0.000000e+00> : vector<2x96xf32>
    %134 = tpu.matmul %126, %133, %cst_58 {dimension_numbers = #tpu.dot_dimension_numbers<[1], [0], [0], [1], [0, 0, 1, 1], [], []>} : vector<2x32xf32>, vector<32x96xf32>, vector<2x96xf32> -> vector<2x96xf32>
    %c0_59 = arith.constant 0 : index
    %c4 = arith.constant 4 : index
    %c0_60 = arith.constant 0 : index
    %135 = vector.load %arg1[%c0_59, %c4, %c0_60] : memref<2x8x96xf32, #tpu.memory_space<vmem>>, vector<2x1x96xf32>
    %136 = vector.shape_cast %135 : vector<2x1x96xf32> to vector<2x96xf32>
    %137 = vector.extract_strided_slice %136 {offsets = [0, 0], sizes = [2, 64], strides = [1, 1]} : vector<2x96xf32> to vector<2x64xf32>
    %138 = vector.extract_strided_slice %134 {offsets = [0, 0], sizes = [2, 64], strides = [1, 1]} : vector<2x96xf32> to vector<2x64xf32>
    %139 = arith.addf %137, %138 : vector<2x64xf32>
    %140 = arith.negf %139 : vector<2x64xf32>
    %141 = math.exp %140 : vector<2x64xf32>
    %cst_61 = arith.constant 1.000000e+00 : f32
    %142 = vector.broadcast %cst_61 : f32 to vector<2x64xf32>
    %143 = arith.addf %142, %141 : vector<2x64xf32>
    %144 = arith.divf %142, %143 : vector<2x64xf32>
    %145 = vector.extract_strided_slice %144 {offsets = [0, 0], sizes = [2, 32], strides = [1, 1]} : vector<2x64xf32> to vector<2x32xf32>
    %146 = vector.extract_strided_slice %144 {offsets = [0, 32], sizes = [2, 32], strides = [1, 1]} : vector<2x64xf32> to vector<2x32xf32>
    %147 = vector.extract_strided_slice %136 {offsets = [0, 64], sizes = [2, 32], strides = [1, 1]} : vector<2x96xf32> to vector<2x32xf32>
    %148 = vector.extract_strided_slice %134 {offsets = [0, 64], sizes = [2, 32], strides = [1, 1]} : vector<2x96xf32> to vector<2x32xf32>
    %149 = vector.broadcast %4 : vector<1x32xf32> to vector<2x32xf32>
    %150 = arith.addf %148, %149 : vector<2x32xf32>
    %151 = arith.mulf %145, %150 : vector<2x32xf32>
    %152 = arith.addf %147, %151 : vector<2x32xf32>
    %153 = math.tanh %152 : vector<2x32xf32>
    %cst_62 = arith.constant 1.000000e+00 : f32
    %154 = vector.broadcast %cst_62 : f32 to vector<2x32xf32>
    %155 = arith.subf %154, %146 : vector<2x32xf32>
    %156 = arith.mulf %155, %153 : vector<2x32xf32>
    %157 = arith.mulf %146, %126 : vector<2x32xf32>
    %158 = arith.addf %156, %157 : vector<2x32xf32>
    %c0_63 = arith.constant 0 : index
    %c4_64 = arith.constant 4 : index
    %c0_65 = arith.constant 0 : index
    %159 = vector.load %arg2[%c0_63, %c4_64, %c0_65] : memref<2x8x32xf32, #tpu.memory_space<vmem>>, vector<2x1x32xf32>
    %160 = vector.shape_cast %159 : vector<2x1x32xf32> to vector<2x32xf32>
    %161 = arith.mulf %158, %160 : vector<2x32xf32>
    %c0_66 = arith.constant 0 : index
    %c4_67 = arith.constant 4 : index
    %c0_68 = arith.constant 0 : index
    %162 = vector.load %arg6[%c0_66, %c4_67, %c0_68] : memref<2x8x32xf32, #tpu.memory_space<vmem>>, vector<2x1x32xf32>
    %163 = vector.shape_cast %162 : vector<2x1x32xf32> to vector<2x32xf32>
    %164 = vector.shape_cast %161 : vector<2x32xf32> to vector<2x1x32xf32>
    tpu.vector_store %arg6[%c0_66, %c4_67, %c0_68], %164 {strides = array<i32>} : memref<2x8x32xf32, #tpu.memory_space<vmem>>, vector<2x1x32xf32>,
    %c0_69 = arith.constant 0 : index
    %c0_70 = arith.constant 0 : index
    %165 = vector.load %arg4[%c0_69, %c0_70] : memref<32x96xf32, #tpu.memory_space<vmem>>, vector<32x96xf32>
    %cst_71 = arith.constant dense<0.000000e+00> : vector<2x96xf32>
    %166 = tpu.matmul %158, %165, %cst_71 {dimension_numbers = #tpu.dot_dimension_numbers<[1], [0], [0], [1], [0, 0, 1, 1], [], []>} : vector<2x32xf32>, vector<32x96xf32>, vector<2x96xf32> -> vector<2x96xf32>
    %c0_72 = arith.constant 0 : index
    %c5 = arith.constant 5 : index
    %c0_73 = arith.constant 0 : index
    %167 = vector.load %arg1[%c0_72, %c5, %c0_73] : memref<2x8x96xf32, #tpu.memory_space<vmem>>, vector<2x1x96xf32>
    %168 = vector.shape_cast %167 : vector<2x1x96xf32> to vector<2x96xf32>
    %169 = vector.extract_strided_slice %168 {offsets = [0, 0], sizes = [2, 64], strides = [1, 1]} : vector<2x96xf32> to vector<2x64xf32>
    %170 = vector.extract_strided_slice %166 {offsets = [0, 0], sizes = [2, 64], strides = [1, 1]} : vector<2x96xf32> to vector<2x64xf32>
    %171 = arith.addf %169, %170 : vector<2x64xf32>
    %172 = arith.negf %171 : vector<2x64xf32>
    %173 = math.exp %172 : vector<2x64xf32>
    %cst_74 = arith.constant 1.000000e+00 : f32
    %174 = vector.broadcast %cst_74 : f32 to vector<2x64xf32>
    %175 = arith.addf %174, %173 : vector<2x64xf32>
    %176 = arith.divf %174, %175 : vector<2x64xf32>
    %177 = vector.extract_strided_slice %176 {offsets = [0, 0], sizes = [2, 32], strides = [1, 1]} : vector<2x64xf32> to vector<2x32xf32>
    %178 = vector.extract_strided_slice %176 {offsets = [0, 32], sizes = [2, 32], strides = [1, 1]} : vector<2x64xf32> to vector<2x32xf32>
    %179 = vector.extract_strided_slice %168 {offsets = [0, 64], sizes = [2, 32], strides = [1, 1]} : vector<2x96xf32> to vector<2x32xf32>
    %180 = vector.extract_strided_slice %166 {offsets = [0, 64], sizes = [2, 32], strides = [1, 1]} : vector<2x96xf32> to vector<2x32xf32>
    %181 = vector.broadcast %4 : vector<1x32xf32> to vector<2x32xf32>
    %182 = arith.addf %180, %181 : vector<2x32xf32>
    %183 = arith.mulf %177, %182 : vector<2x32xf32>
    %184 = arith.addf %179, %183 : vector<2x32xf32>
    %185 = math.tanh %184 : vector<2x32xf32>
    %cst_75 = arith.constant 1.000000e+00 : f32
    %186 = vector.broadcast %cst_75 : f32 to vector<2x32xf32>
    %187 = arith.subf %186, %178 : vector<2x32xf32>
    %188 = arith.mulf %187, %185 : vector<2x32xf32>
    %189 = arith.mulf %178, %158 : vector<2x32xf32>
    %190 = arith.addf %188, %189 : vector<2x32xf32>
    %c0_76 = arith.constant 0 : index
    %c5_77 = arith.constant 5 : index
    %c0_78 = arith.constant 0 : index
    %191 = vector.load %arg2[%c0_76, %c5_77, %c0_78] : memref<2x8x32xf32, #tpu.memory_space<vmem>>, vector<2x1x32xf32>
    %192 = vector.shape_cast %191 : vector<2x1x32xf32> to vector<2x32xf32>
    %193 = arith.mulf %190, %192 : vector<2x32xf32>
    %c0_79 = arith.constant 0 : index
    %c5_80 = arith.constant 5 : index
    %c0_81 = arith.constant 0 : index
    %194 = vector.load %arg6[%c0_79, %c5_80, %c0_81] : memref<2x8x32xf32, #tpu.memory_space<vmem>>, vector<2x1x32xf32>
    %195 = vector.shape_cast %194 : vector<2x1x32xf32> to vector<2x32xf32>
    %196 = vector.shape_cast %193 : vector<2x32xf32> to vector<2x1x32xf32>
    tpu.vector_store %arg6[%c0_79, %c5_80, %c0_81], %196 {strides = array<i32>} : memref<2x8x32xf32, #tpu.memory_space<vmem>>, vector<2x1x32xf32>,
    %c0_82 = arith.constant 0 : index
    %c0_83 = arith.constant 0 : index
    %197 = vector.load %arg4[%c0_82, %c0_83] : memref<32x96xf32, #tpu.memory_space<vmem>>, vector<32x96xf32>
    %cst_84 = arith.constant dense<0.000000e+00> : vector<2x96xf32>
    %198 = tpu.matmul %190, %197, %cst_84 {dimension_numbers = #tpu.dot_dimension_numbers<[1], [0], [0], [1], [0, 0, 1, 1], [], []>} : vector<2x32xf32>, vector<32x96xf32>, vector<2x96xf32> -> vector<2x96xf32>
    %c0_85 = arith.constant 0 : index
    %c6 = arith.constant 6 : index
    %c0_86 = arith.constant 0 : index
    %199 = vector.load %arg1[%c0_85, %c6, %c0_86] : memref<2x8x96xf32, #tpu.memory_space<vmem>>, vector<2x1x96xf32>
    %200 = vector.shape_cast %199 : vector<2x1x96xf32> to vector<2x96xf32>
    %201 = vector.extract_strided_slice %200 {offsets = [0, 0], sizes = [2, 64], strides = [1, 1]} : vector<2x96xf32> to vector<2x64xf32>
    %202 = vector.extract_strided_slice %198 {offsets = [0, 0], sizes = [2, 64], strides = [1, 1]} : vector<2x96xf32> to vector<2x64xf32>
    %203 = arith.addf %201, %202 : vector<2x64xf32>
    %204 = arith.negf %203 : vector<2x64xf32>
    %205 = math.exp %204 : vector<2x64xf32>
    %cst_87 = arith.constant 1.000000e+00 : f32
    %206 = vector.broadcast %cst_87 : f32 to vector<2x64xf32>
    %207 = arith.addf %206, %205 : vector<2x64xf32>
    %208 = arith.divf %206, %207 : vector<2x64xf32>
    %209 = vector.extract_strided_slice %208 {offsets = [0, 0], sizes = [2, 32], strides = [1, 1]} : vector<2x64xf32> to vector<2x32xf32>
    %210 = vector.extract_strided_slice %208 {offsets = [0, 32], sizes = [2, 32], strides = [1, 1]} : vector<2x64xf32> to vector<2x32xf32>
    %211 = vector.extract_strided_slice %200 {offsets = [0, 64], sizes = [2, 32], strides = [1, 1]} : vector<2x96xf32> to vector<2x32xf32>
    %212 = vector.extract_strided_slice %198 {offsets = [0, 64], sizes = [2, 32], strides = [1, 1]} : vector<2x96xf32> to vector<2x32xf32>
    %213 = vector.broadcast %4 : vector<1x32xf32> to vector<2x32xf32>
    %214 = arith.addf %212, %213 : vector<2x32xf32>
    %215 = arith.mulf %209, %214 : vector<2x32xf32>
    %216 = arith.addf %211, %215 : vector<2x32xf32>
    %217 = math.tanh %216 : vector<2x32xf32>
    %cst_88 = arith.constant 1.000000e+00 : f32
    %218 = vector.broadcast %cst_88 : f32 to vector<2x32xf32>
    %219 = arith.subf %218, %210 : vector<2x32xf32>
    %220 = arith.mulf %219, %217 : vector<2x32xf32>
    %221 = arith.mulf %210, %190 : vector<2x32xf32>
    %222 = arith.addf %220, %221 : vector<2x32xf32>
    %c0_89 = arith.constant 0 : index
    %c6_90 = arith.constant 6 : index
    %c0_91 = arith.constant 0 : index
    %223 = vector.load %arg2[%c0_89, %c6_90, %c0_91] : memref<2x8x32xf32, #tpu.memory_space<vmem>>, vector<2x1x32xf32>
    %224 = vector.shape_cast %223 : vector<2x1x32xf32> to vector<2x32xf32>
    %225 = arith.mulf %222, %224 : vector<2x32xf32>
    %c0_92 = arith.constant 0 : index
    %c6_93 = arith.constant 6 : index
    %c0_94 = arith.constant 0 : index
    %226 = vector.load %arg6[%c0_92, %c6_93, %c0_94] : memref<2x8x32xf32, #tpu.memory_space<vmem>>, vector<2x1x32xf32>
    %227 = vector.shape_cast %226 : vector<2x1x32xf32> to vector<2x32xf32>
    %228 = vector.shape_cast %225 : vector<2x32xf32> to vector<2x1x32xf32>
    tpu.vector_store %arg6[%c0_92, %c6_93, %c0_94], %228 {strides = array<i32>} : memref<2x8x32xf32, #tpu.memory_space<vmem>>, vector<2x1x32xf32>,
    %c0_95 = arith.constant 0 : index
    %c0_96 = arith.constant 0 : index
    %229 = vector.load %arg4[%c0_95, %c0_96] : memref<32x96xf32, #tpu.memory_space<vmem>>, vector<32x96xf32>
    %cst_97 = arith.constant dense<0.000000e+00> : vector<2x96xf32>
    %230 = tpu.matmul %222, %229, %cst_97 {dimension_numbers = #tpu.dot_dimension_numbers<[1], [0], [0], [1], [0, 0, 1, 1], [], []>} : vector<2x32xf32>, vector<32x96xf32>, vector<2x96xf32> -> vector<2x96xf32>
    %c0_98 = arith.constant 0 : index
    %c7 = arith.constant 7 : index
    %c0_99 = arith.constant 0 : index
    %231 = vector.load %arg1[%c0_98, %c7, %c0_99] : memref<2x8x96xf32, #tpu.memory_space<vmem>>, vector<2x1x96xf32>
    %232 = vector.shape_cast %231 : vector<2x1x96xf32> to vector<2x96xf32>
    %233 = vector.extract_strided_slice %232 {offsets = [0, 0], sizes = [2, 64], strides = [1, 1]} : vector<2x96xf32> to vector<2x64xf32>
    %234 = vector.extract_strided_slice %230 {offsets = [0, 0], sizes = [2, 64], strides = [1, 1]} : vector<2x96xf32> to vector<2x64xf32>
    %235 = arith.addf %233, %234 : vector<2x64xf32>
    %236 = arith.negf %235 : vector<2x64xf32>
    %237 = math.exp %236 : vector<2x64xf32>
    %cst_100 = arith.constant 1.000000e+00 : f32
    %238 = vector.broadcast %cst_100 : f32 to vector<2x64xf32>
    %239 = arith.addf %238, %237 : vector<2x64xf32>
    %240 = arith.divf %238, %239 : vector<2x64xf32>
    %241 = vector.extract_strided_slice %240 {offsets = [0, 0], sizes = [2, 32], strides = [1, 1]} : vector<2x64xf32> to vector<2x32xf32>
    %242 = vector.extract_strided_slice %240 {offsets = [0, 32], sizes = [2, 32], strides = [1, 1]} : vector<2x64xf32> to vector<2x32xf32>
    %243 = vector.extract_strided_slice %232 {offsets = [0, 64], sizes = [2, 32], strides = [1, 1]} : vector<2x96xf32> to vector<2x32xf32>
    %244 = vector.extract_strided_slice %230 {offsets = [0, 64], sizes = [2, 32], strides = [1, 1]} : vector<2x96xf32> to vector<2x32xf32>
    %245 = vector.broadcast %4 : vector<1x32xf32> to vector<2x32xf32>
    %246 = arith.addf %244, %245 : vector<2x32xf32>
    %247 = arith.mulf %241, %246 : vector<2x32xf32>
    %248 = arith.addf %243, %247 : vector<2x32xf32>
    %249 = math.tanh %248 : vector<2x32xf32>
    %cst_101 = arith.constant 1.000000e+00 : f32
    %250 = vector.broadcast %cst_101 : f32 to vector<2x32xf32>
    %251 = arith.subf %250, %242 : vector<2x32xf32>
    %252 = arith.mulf %251, %249 : vector<2x32xf32>
    %253 = arith.mulf %242, %222 : vector<2x32xf32>
    %254 = arith.addf %252, %253 : vector<2x32xf32>
    %c0_102 = arith.constant 0 : index
    %c7_103 = arith.constant 7 : index
    %c0_104 = arith.constant 0 : index
    %255 = vector.load %arg2[%c0_102, %c7_103, %c0_104] : memref<2x8x32xf32, #tpu.memory_space<vmem>>, vector<2x1x32xf32>
    %256 = vector.shape_cast %255 : vector<2x1x32xf32> to vector<2x32xf32>
    %257 = arith.mulf %254, %256 : vector<2x32xf32>
    %c0_105 = arith.constant 0 : index
    %c7_106 = arith.constant 7 : index
    %c0_107 = arith.constant 0 : index
    %258 = vector.load %arg6[%c0_105, %c7_106, %c0_107] : memref<2x8x32xf32, #tpu.memory_space<vmem>>, vector<2x1x32xf32>
    %259 = vector.shape_cast %258 : vector<2x1x32xf32> to vector<2x32xf32>
    %260 = vector.shape_cast %257 : vector<2x32xf32> to vector<2x1x32xf32>
    tpu.vector_store %arg6[%c0_105, %c7_106, %c0_107], %260 {strides = array<i32>} : memref<2x8x32xf32, #tpu.memory_space<vmem>>, vector<2x1x32xf32>,
    %c0_108 = arith.constant 0 : index
    %c0_109 = arith.constant 0 : index
    %261 = vector.load %arg8[%c0_108, %c0_109] : memref<2x32xf32, #tpu.memory_space<vmem>>, vector<2x32xf32>
    tpu.vector_store %arg8[%c0_108, %c0_109], %254 {strides = array<i32>} : memref<2x32xf32, #tpu.memory_space<vmem>>, vector<2x32xf32>,
    %c0_110 = arith.constant 0 : index
    %c0_111 = arith.constant 0 : index
    %262 = vector.load %arg7[%c0_110, %c0_111] : memref<2x32xf32, #tpu.memory_space<vmem>>, vector<2x32xf32>
    tpu.vector_store %arg7[%c0_110, %c0_111], %254 {strides = array<i32>} : memref<2x32xf32, #tpu.memory_space<vmem>>, vector<2x32xf32>,
    return
  }
  func.func @transform_0(%arg0: i32) -> (i32, i32, i32) {
    %c0_i32 = arith.constant 0 : i32
    %c0_i32_0 = arith.constant 0 : i32
    %c0_i32_1 = arith.constant 0 : i32
    return %c0_i32, %arg0, %c0_i32_0 : i32, i32, i32
  }
  func.func @transform_1(%arg0: i32) -> (i32, i32, i32) {
    %c0_i32 = arith.constant 0 : i32
    %c0_i32_0 = arith.constant 0 : i32
    %c0_i32_1 = arith.constant 0 : i32
    return %c0_i32, %arg0, %c0_i32_0 : i32, i32, i32
  }
  func.func @transform_2(%arg0: i32) -> (i32, i32) {
    %c0_i32 = arith.constant 0 : i32
    %c0_i32_0 = arith.constant 0 : i32
    %c0_i32_1 = arith.constant 0 : i32
    return %c0_i32, %c0_i32_0 : i32, i32
  }
  func.func @transform_3(%arg0: i32) -> (i32, i32) {
    %c0_i32 = arith.constant 0 : i32
    %c0_i32_0 = arith.constant 0 : i32
    %c0_i32_1 = arith.constant 0 : i32
    return %c0_i32, %c0_i32_0 : i32, i32
  }
  func.func @transform_4(%arg0: i32) -> (i32, i32) {
    %c0_i32 = arith.constant 0 : i32
    %c0_i32_0 = arith.constant 0 : i32
    %c0_i32_1 = arith.constant 0 : i32
    return %c0_i32, %c0_i32_0 : i32, i32
  }
  func.func @transform_5(%arg0: i32) -> (i32, i32, i32) {
    %c0_i32 = arith.constant 0 : i32
    %c0_i32_0 = arith.constant 0 : i32
    %c0_i32_1 = arith.constant 0 : i32
    return %c0_i32, %arg0, %c0_i32_0 : i32, i32, i32
  }
  func.func @transform_6(%arg0: i32) -> (i32, i32) {
    %c0_i32 = arith.constant 0 : i32
    %c0_i32_0 = arith.constant 0 : i32
    %c0_i32_1 = arith.constant 0 : i32
    return %c0_i32, %c0_i32_0 : i32, i32
  }
}

</mosaic_0001>

<bundles_post_ra>
// kernel: feedback_rnn.2
= control target key start
LH: loop header
LB: loop body
LE: loop exit
PB: predicated region body
PF: predicated region fallthrough
CT: control target
= control target key end

     0   :  { %vm29_vm0 = vcmask 261120   ;;  %vm111_vm1 = vcmask 785408   ;;  %s238_s1 = inlined_call_operand.vmem [shape: f32[32,128], index: 1, kind: input, shape index: {}]   ;;  %s239_s0 = inlined_call_operand.vmem [shape: f32[16,32], index: 0, kind: input, shape index: {}]   ;;  %s240_s2 = inlined_call_operand.vmem [shape: f32[1,128], index: 2, kind: input, shape index: {}]   ;;  %s241_s3 = inlined_call_operand.vmem [shape: f32[16,96], index: 3, kind: output, shape index: {0}]   ;;  %s242_s4 = inlined_call_operand.vmem [shape: f32[16,32], index: 4, kind: output, shape index: {1}]  }
   0x1   :  { %v21_v0 = vld [vmem:[%s238_s1 + $0x18] sm:$0xff]  ;;  %v20_v1 = vld [vmem:[%s238_s1 + $0x10] sm:$0xff]  ;;  %v16_v2 = vld [vmem:[%s239_s0] sm:$0xff] }
   0x2   :  { %155 = vmatprep.subr.mxu0 %v21_v0  ;;  %v19_v3 = vld [vmem:[%s238_s1 + $0x8] sm:$0xff]  ;;  %163 = vmatprep.mubr.msk.f32.mxu0 %vm29_vm0, %v16_v2  ;;  %v18_v4 = vld [vmem:[%s238_s1] sm:$0xff] }
   0x3   :  { %156 = vmatpush3.msra.mxu0 %v21_v0  ;;  %v17_v5 = vld [vmem:[%s239_s0 + $0x8] sm:$0xff]  ;;  %v144_v6 = vld [vmem:[%s240_s2] ss:$0 sm:$0xff]  ;;  %s175_s2 = smov 32  }
   0x4   :  { %157 = vmatprep.subr.mxu0 %v20_v1 }
   0x5   :  { %158 = vmatpush3.msra.mxu0 %v20_v1 }
   0x6   :  { %159 = vmatprep.subr.mxu0 %v19_v3 }
   0x7   :  { %160 = vmatpush3.msra.mxu0 %v19_v3 }
   0x8   :  { %161 = vmatprep.subr.mxu0 %v18_v4 }
   0x9   :  { %162 = vmatpush3.msra.mxu0 %v18_v4 }
   0xa   :  { %164 = vmatmul.mubr.msk.f32.vlgmr.msra.gmra.mxu0 %vm29_vm0, %v17_v5 }
  0xca   :  { %v165_v7 = vpop.f32.mrf.mxu0 }
  0xcb   :  { %v108_v8 = vadd.f32 %v165_v7, %v144_v6 }
  0xcc   :  { %v102_v9 = vpop.f32.mrf.mxu0 }
  0xcd   :  { %113 = vst.msk [vmem:[%s241_s3 + $0x8] sm:$0xff] %vm111_vm1, %v108_v8  ;;  %v148_v10 = vmul.f32 -1.442695, %v108_v8  ;;  %v103_v11 = vadd.f32 %v144_v6, %v102_v9 }
  0xcf   :  { %112 = vst.msk [vmem:[%s241_s3] sm:$0xff] %vm111_vm1, %v103_v11  ;;  %v147_v12 = vmul.f32 -1.442695, %v103_v11  ;;  %167 = vpow2.f32 %v148_v10 }
  0xd1   :  { %169 = vpow2.f32 %v147_v12 }
  0xdc   :  { %v168_v13 = vpop.eup %167 }
  0xdd   :  { %v121_v16 = vadd.f32 1.0, %v168_v13 }
  0xde   :  { %v170_v14 = vpop.eup %169 }
  0xdf   :  { %v120_v15 = vadd.f32 1.0, %v170_v14 }
  0xe1   :  { %171 = vrcp.f32 %v120_v15 }
  0xe2   :  { %173 = vrcp.f32 %v121_v16 }
  0xee   :  { %v172_v17 = vpop.eup %171 }
  0xef   :  { %128 = vrot.lane.b32.xlu0 %v172_v17, %s175_s2  ;;  %v174_v18 = vpop.eup %173 }
  0xf3   :  { %130 = vrot.lane.b32.xlu0 %v174_v18, %s175_s2 }
 0x161   :  { %v129_v19 = vpop.permute.xlu0 %128 }
 0x162   :  { %134 = vst.msk [vmem:[%s242_s4] sm:$0xff] %vm29_vm0, %v129_v19 }
 0x165   :  { %v131_v20 = vpop.permute.xlu0 %130 }
 0x166   :  { %135 = vst.msk [vmem:[%s242_s4 + $0x8] sm:$0xff] %vm29_vm0, %v131_v20 }

// kernel: feedback_rnn.3
= control target key start
LH: loop header
LB: loop body
LE: loop exit
PB: predicated region body
PF: predicated region fallthrough
CT: control target
= control target key end

     0   :  { %12 = vsyncpa [#allocation4], 0  ;;  %vm29_vm0 = vcmask 254976   ;;  %v1692_v1 = vmov 0.0   ;;  %vm1693_vm1 = vmmov 0   ;;  %s2160_s0 = inlined_call_operand.vmem [shape: f32[2,8,96], index: 0, kind: input, shape index: {}]   ;;  %s2161_s1 = inlined_call_operand.vmem [shape: f32[2,8,32], index: 1, kind: input, shape index: {}]   ;;  %s2162_s2 = inlined_call_operand.vmem [shape: f32[2,32], index: 2, kind: input, shape index: {}]   ;;  %s2163_s3 = inlined_call_operand.vmem [shape: f32[32,96], index: 3, kind: input, shape index: {}]   ;;  %s2164_s4 = inlined_call_operand.vmem [shape: f32[1,32], index: 4, kind: input, shape index: {}]   ;;  %s2165_s5 = inlined_call_operand.hbm [shape: f32[2,8,32], index: 5, kind: output, shape index: {0}]   ;;  %s2166_s6 = inlined_call_operand.hbm [shape: f32[2,32], index: 6, kind: output, shape index: {1}]  }
   0x1   :  { %v1739_v0 = vld [vmem:[%s2163_s3 + $0x18] sm:$0xff]  ;;  %1455 = vmatprep.subr.mxu0 %v1692_v1  ;;  %v1745_v2 = vld [vmem:[%s2163_s3 + $0x10] sm:$0xff]  ;;  %1463 = vmatprep.mubr.msk.f32.mxu0 %vm1693_vm1, %v1692_v1  ;;  %v28_v3 = vld [vmem:[%s2162_s2] sm:$0x3] }
   0x2   :  { %v1393_v4 = vld [vmem:[%s2164_s4] ss:$0 sm:$0xff]  ;;  %1456 = vmatpush3.msra.mxu0 %v1739_v0  ;;  %30 = vst.msk [vmem:[#allocation2] sm:$0x3] %vm29_vm0, %v28_v3  ;;  %1466 = vmatprep.subr.mxu1 %v1692_v1 }
   0x3   :  { %13 = vsyncpa [#allocation6], 0  ;;  %1457 = vmatprep.subr.mxu0 %v1692_v1  ;;  %v1762_v5 = vld [vmem:[%s2163_s3 + $0x8] sm:$0xff]  ;;  %s1694_s7 = smov 64   ;;  %1467 = vmatpush3.msra.mxu1 %v1739_v0  ;;  %v1771_v6 = vld [vmem:[%s2163_s3] sm:$0xff]  ;;  %vm37_vm2 = vcmask 261120  }
   0x4   :  { %136 = vrot.lane.b32.xlu0 %v1393_v4, %s1694_s7  ;;  %1458 = vmatpush3.msra.mxu0 %v1745_v2  ;;  %v111_v13 = vld [vmem:[%s2160_s0] sm:$0x1]  ;;  %v112_v15 = vld [vmem:[%s2160_s0 + $0x8] sm:$0x1]  ;;  %s1695_s11 = smov 32   ;;  %s1696_s12 = smov 96  }
   0x5   :  { %1459 = vmatprep.subr.mxu0 %v1692_v1  ;;  %1468 = vmatprep.subr.mxu1 %v1692_v1  ;;  %vm215_vm3 = vcmask 1041409   ;;  %v291_v56 = vld [vmem:[%s2160_s0 + $0x1] sm:$0x1]  ;;  %v292_v58 = vld [vmem:[%s2160_s0 + $0x9] sm:$0x1]  ;;  %vm205_vm4 = vcmask 253952  }
   0x6   :  { %1460 = vmatpush3.msra.mxu0 %v1762_v5  ;;  %1469 = vmatpush3.msra.mxu1 %v1745_v2 }
   0x7   :  { %1461 = vmatprep.subr.mxu0 %v1692_v1  ;;  %1470 = vmatprep.subr.mxu1 %v1692_v1 }
   0x8   :  { %1462 = vmatpush3.msra.mxu0 %v1771_v6  ;;  %1471 = vmatpush3.msra.mxu1 %v1762_v5 }
   0x9   :  { %v31_v7 = vld [vmem:[#allocation2] sm:$0x3]  ;;  %1472 = vmatprep.subr.mxu1 %v1692_v1  ;;  %1474 = vmatprep.mubr.msk.f32.mxu1 %vm1693_vm1, %v1692_v1 }
   0xa   :  { %1464 = vmatmul.mubr.msk.f32.vlgmr.msra.gmra.mxu0 %vm37_vm2, %v31_v7  ;;  %1473 = vmatpush3.msra.mxu1 %v1771_v6  ;;  %v174_v30 = vrot.slane %v31_v7, 1 }
   0xb   :  { %1477 = vmatprep.subr.mxu0 %v1692_v1  ;;  %1485 = vmatprep.mubr.msk.f32.mxu0 %vm1693_vm1, %v1692_v1 }
   0xc   :  { %1478 = vmatpush3.msra.mxu0 %v1739_v0  ;;  %1488 = vmatprep.subr.mxu1 %v1692_v1 }
   0xd   :  { %1479 = vmatprep.subr.mxu0 %v1692_v1 }
   0xe   :  { %1480 = vmatpush3.msra.mxu0 %v1745_v2 }
   0xf   :  { %1481 = vmatprep.subr.mxu0 %v1692_v1 }
  0x10   :  { %1482 = vmatpush3.msra.mxu0 %v1762_v5 }
  0x11   :  { %1483 = vmatprep.subr.mxu0 %v1692_v1 }
  0x12   :  { %1484 = vmatpush3.msra.mxu0 %v1771_v6 }
  0x13   :  { %1499 = vmatprep.subr.mxu0 %v1692_v1 }
  0x76   :  { %v1797_v8 = vpop.permute.xlu0 %136 }
  0xca   :  { %v107_v9 = vpop.f32.mrf.mxu0 }
  0xcb   :  { %v139_v10 = vadd.f32 %v1797_v8, %v107_v9  ;;  %v114_v14 = vrot.slane %v107_v9, 1  ;;  %v117_v16 = vadd.f32 %v111_v13, %v107_v9 }
  0xcc   :  { %v1465_v11 = vpop.f32.mrf.mxu0 }
  0xcd   :  { %142 = vrot.lane.b32.xlu1 %v139_v10, %s1694_s7  ;;  %v141_v12 = vrot.slane %v139_v10, 1  ;;  %v118_v17 = vadd.f32 %v114_v14, %v112_v15  ;;  %v1391_v18 = vmul.f32 -1.442695, %v117_v16 }
  0xcf   :  { %144 = vrot.lane.b32.xlu0 %v141_v12, %s1694_s7  ;;  %v1392_v19 = vmul.f32 -1.442695, %v118_v17  ;;  %1552 = vpow2.f32 %v1391_v18 }
  0xd1   :  { %1554 = vpow2.f32 %v1392_v19 }
  0xdc   :  { %v1553_v20 = vpop.eup %1552 }
  0xdd   :  { %v125_v22 = vadd.f32 1.0, %v1553_v20 }
  0xde   :  { %v1555_v21 = vpop.eup %1554 }
  0xdf   :  { %v126_v23 = vadd.f32 1.0, %v1555_v21  ;;  %1556 = vrcp.f32 %v125_v22 }
  0xe1   :  { %1558 = vrcp.f32 %v126_v23 }
  0xec   :  { %v1557_v24 = vpop.eup %1556 }
  0xed   :  { %v162_v44 = vsub.f32 1.0, %v1557_v24 }
  0xee   :  { %v1559_v27 = vpop.eup %1558 }
  0xef   :  { %v163_v38 = vsub.f32 1.0, %v1559_v27 }
 0x13f   :  { %v143_v25 = vpop.permute.xlu1 %142 }
 0x140   :  { %v148_v26 = vmul.f32 %v1557_v24, %v143_v25 }
 0x141   :  { %v145_v28 = vpop.permute.xlu0 %144 }
 0x142   :  { %v149_v29 = vmul.f32 %v1559_v27, %v145_v28  ;;  %152 = vrot.lane.b32.xlu0 %v148_v26, %s1694_s7 }
 0x144   :  { %154 = vrot.lane.b32.xlu1 %v149_v29, %s1694_s7 }
 0x146   :  { %177 = vrot.lane.b32.xlu0 %v174_v30, %s1695_s11 }
 0x14a   :  { %175 = vrot.lane.b32.xlu0 %v31_v7, %s1695_s11 }
 0x1b4   :  { %v153_v31 = vpop.permute.xlu0 %152 }
 0x1b5   :  { %v158_v34 = vadd.f32 %v153_v31, %v111_v13 }
 0x1b6   :  { %v155_v32 = vpop.permute.xlu1 %154 }
 0x1b7   :  { %v159_v33 = vadd.f32 %v155_v32, %v112_v15 }
 0x1b8   :  { %v178_v37 = vpop.permute.xlu0 %177 }
 0x1b9   :  { %1560 = vtanh.f32 %v159_v33  ;;  %v182_v40 = vmul.f32 %v1559_v27, %v178_v37 }
 0x1ba   :  { %1562 = vtanh.f32 %v158_v34 }
 0x1bc   :  { %v176_v42 = vpop.permute.xlu0 %175 }
 0x1bd   :  { %v181_v46 = vmul.f32 %v1557_v24, %v176_v42 }
 0x1c6   :  { %v1561_v35 = vpop.eup %1560 }
 0x1c7   :  { %168 = vrot.lane.b32.xlu1 %v1561_v35, %s1696_s12  ;;  %v1563_v36 = vpop.eup %1562 }
 0x1cb   :  { %166 = vrot.lane.b32.xlu1 %v1563_v36, %s1696_s12 }
 0x239   :  { %v169_v39 = vpop.permute.xlu1 %168 }
 0x23a   :  { %v173_v41 = vmul.f32 %v169_v39, %v163_v38  ;;  %v454_v38 = vld [vmem:[%s2160_s0 + $0x2] sm:$0x1] }
 0x23c   :  { %v1814_v43 = vadd.f32 %v182_v40, %v173_v41  ;;  %v455_v40 = vld [vmem:[%s2160_s0 + $0xa] sm:$0x1] }
 0x23d   :  { %v167_v45 = vpop.permute.xlu1 %166 }
 0x23e   :  { %v172_v47 = vmul.f32 %v167_v45, %v162_v44  ;;  %v214_v49 = vrot.slane %v1814_v43, 7 }
 0x240   :  { %v1816_v48 = vadd.f32 %v181_v46, %v172_v47 }
 0x242   :  { %v216_v50 = vsel %vm215_vm3, %v214_v49, %v1816_v48 }
 0x243   :  { %217 = vrot.lane.b32.xlu1 %v216_v50, %s1696_s12 }
 0x2b5   :  { %v218_v51 = vpop.permute.xlu1 %217 }
 0x2b6   :  { %1475 = vmatmul.mubr.msk.f32.vlgmr.msra.gmra.mxu1 %vm37_vm2, %v218_v51 }
 0x2b7   :  { %1489 = vmatpush3.msra.mxu1 %v1739_v0  ;;  %1496 = vmatprep.mubr.msk.f32.mxu1 %vm1693_vm1, %v1692_v1 }
 0x2b8   :  { %1490 = vmatprep.subr.mxu1 %v1692_v1 }
 0x2b9   :  { %1491 = vmatpush3.msra.mxu1 %v1745_v2 }
 0x2ba   :  { %1492 = vmatprep.subr.mxu1 %v1692_v1 }
 0x2bb   :  { %1493 = vmatpush3.msra.mxu1 %v1762_v5 }
 0x2bc   :  { %1494 = vmatprep.subr.mxu1 %v1692_v1 }
 0x2bd   :  { %1495 = vmatpush3.msra.mxu1 %v1771_v6 }
 0x2be   :  { %1510 = vmatprep.subr.mxu1 %v1692_v1 }
 0x376   :  { %v287_v52 = vpop.f32.mrf.mxu1 }
 0x377   :  { %v311_v53 = vadd.f32 %v287_v52, %v1797_v8  ;;  %v294_v57 = vrot.slane %v287_v52, 1  ;;  %v297_v59 = vadd.f32 %v291_v56, %v287_v52 }
 0x378   :  { %v1476_v54 = vpop.f32.mrf.mxu1 }
 0x379   :  { %314 = vrot.lane.b32.xlu1 %v311_v53, %s1694_s7  ;;  %v313_v55 = vrot.slane %v311_v53, 1  ;;  %v298_v60 = vadd.f32 %v294_v57, %v292_v58  ;;  %v1395_v61 = vmul.f32 -1.442695, %v297_v59 }
 0x37b   :  { %316 = vrot.lane.b32.xlu0 %v313_v55, %s1694_s7  ;;  %v1396_v62 = vmul.f32 -1.442695, %v298_v60  ;;  %1564 = vpow2.f32 %v1395_v61 }
 0x37d   :  { %1566 = vpow2.f32 %v1396_v62 }
 0x388   :  { %v1565_v63 = vpop.eup %1564 }
 0x389   :  { %v305_v4 = vadd.f32 1.0, %v1565_v63 }
 0x38a   :  { %v1567_v3 = vpop.eup %1566 }
 0x38b   :  { %v306_v7 = vadd.f32 1.0, %v1567_v3  ;;  %1568 = vrcp.f32 %v305_v4 }
 0x38d   :  { %1570 = vrcp.f32 %v306_v7 }
 0x398   :  { %v1569_v9 = vpop.eup %1568 }
 0x399   :  { %v334_v22 = vsub.f32 1.0, %v1569_v9  ;;  %v346_v28 = vmul.f32 %v1569_v9, %v1816_v48 }
 0x39a   :  { %v1571_v12 = vpop.eup %1570 }
 0x39b   :  { %v335_v23 = vsub.f32 1.0, %v1571_v12  ;;  %v347_v26 = vmul.f32 %v1571_v12, %v1814_v43 }
 0x3eb   :  { %v315_v10 = vpop.permute.xlu1 %314 }
 0x3ec   :  { %v320_v11 = vmul.f32 %v1569_v9, %v315_v10 }
 0x3ed   :  { %v317_v13 = vpop.permute.xlu0 %316 }
 0x3ee   :  { %v321_v14 = vmul.f32 %v1571_v12, %v317_v13  ;;  %324 = vrot.lane.b32.xlu1 %v320_v11, %s1694_s7 }
 0x3f0   :  { %326 = vrot.lane.b32.xlu0 %v321_v14, %s1694_s7 }
 0x460   :  { %v325_v15 = vpop.permute.xlu1 %324 }
 0x461   :  { %v330_v16 = vadd.f32 %v325_v15, %v291_v56 }
 0x462   :  { %v327_v17 = vpop.permute.xlu0 %326 }
 0x463   :  { %1572 = vtanh.f32 %v330_v16  ;;  %v331_v18 = vadd.f32 %v327_v17, %v292_v58 }
 0x465   :  { %1574 = vtanh.f32 %v331_v18 }
 0x470   :  { %v1573_v19 = vpop.eup %1572 }
 0x471   :  { %338 = vrot.lane.b32.xlu1 %v1573_v19, %s1696_s12 }
 0x472   :  { %v1575_v20 = vpop.eup %1574 }
 0x473   :  { %340 = vrot.lane.b32.xlu0 %v1575_v20, %s1696_s12 }
 0x4e3   :  { %v339_v21 = vpop.permute.xlu1 %338 }
 0x4e4   :  { %v344_v25 = vmul.f32 %v339_v21, %v334_v22  ;;  %v617_v22 = vld [vmem:[%s2160_s0 + $0x3] sm:$0x1] }
 0x4e5   :  { %v341_v24 = vpop.permute.xlu0 %340 }
 0x4e6   :  { %v345_v27 = vmul.f32 %v341_v24, %v335_v23  ;;  %v1850_v30 = vadd.f32 %v346_v28, %v344_v25  ;;  %v618_v24 = vld [vmem:[%s2160_s0 + $0xb] sm:$0x1] }
 0x4e8   :  { %v1848_v29 = vadd.f32 %v347_v26, %v345_v27 }
 0x4ea   :  { %v378_v31 = vrot.slane %v1848_v29, 7 }
 0x4ec   :  { %v379_v32 = vsel %vm215_vm3, %v378_v31, %v1850_v30 }
 0x4ed   :  { %380 = vrot.lane.b32.xlu0 %v379_v32, %s1696_s12 }
 0x55f   :  { %v381_v33 = vpop.permute.xlu0 %380 }
 0x560   :  { %1486 = vmatmul.mubr.msk.f32.vlgmr.msra.gmra.mxu0 %vm37_vm2, %v381_v33 }
 0x561   :  { %1500 = vmatpush3.msra.mxu0 %v1739_v0  ;;  %1507 = vmatprep.mubr.msk.f32.mxu0 %vm1693_vm1, %v1692_v1 }
 0x562   :  { %1501 = vmatprep.subr.mxu0 %v1692_v1 }
 0x563   :  { %1502 = vmatpush3.msra.mxu0 %v1745_v2 }
 0x564   :  { %1503 = vmatprep.subr.mxu0 %v1692_v1 }
 0x565   :  { %1504 = vmatpush3.msra.mxu0 %v1762_v5 }
 0x566   :  { %1505 = vmatprep.subr.mxu0 %v1692_v1 }
 0x567   :  { %1506 = vmatpush3.msra.mxu0 %v1771_v6 }
 0x568   :  { %1521 = vmatprep.subr.mxu0 %v1692_v1 }
 0x620   :  { %v450_v34 = vpop.f32.mrf.mxu0 }
 0x621   :  { %v474_v35 = vadd.f32 %v450_v34, %v1797_v8  ;;  %v457_v39 = vrot.slane %v450_v34, 1  ;;  %v460_v41 = vadd.f32 %v454_v38, %v450_v34 }
 0x622   :  { %v1487_v36 = vpop.f32.mrf.mxu0 }
 0x623   :  { %477 = vrot.lane.b32.xlu0 %v474_v35, %s1694_s7  ;;  %v476_v37 = vrot.slane %v474_v35, 1  ;;  %v461_v42 = vadd.f32 %v457_v39, %v455_v40  ;;  %v1398_v44 = vmul.f32 -1.442695, %v460_v41 }
 0x625   :  { %479 = vrot.lane.b32.xlu1 %v476_v37, %s1694_s7  ;;  %v1399_v45 = vmul.f32 -1.442695, %v461_v42  ;;  %1576 = vpow2.f32 %v1398_v44 }
 0x627   :  { %1578 = vpow2.f32 %v1399_v45 }
 0x632   :  { %v1577_v46 = vpop.eup %1576 }
 0x633   :  { %v468_v49 = vadd.f32 1.0, %v1577_v46 }
 0x634   :  { %v1579_v47 = vpop.eup %1578 }
 0x635   :  { %v469_v50 = vadd.f32 1.0, %v1579_v47  ;;  %1580 = vrcp.f32 %v468_v49 }
 0x637   :  { %1582 = vrcp.f32 %v469_v50 }
 0x642   :  { %v1581_v51 = vpop.eup %1580 }
 0x643   :  { %v497_v3 = vsub.f32 1.0, %v1581_v51  ;;  %v509_v12 = vmul.f32 %v1581_v51, %v1850_v30 }
 0x644   :  { %v1583_v54 = vpop.eup %1582 }
 0x645   :  { %v498_v4 = vsub.f32 1.0, %v1583_v54  ;;  %v510_v10 = vmul.f32 %v1583_v54, %v1848_v29 }
 0x695   :  { %v478_v52 = vpop.permute.xlu0 %477 }
 0x696   :  { %v483_v53 = vmul.f32 %v1581_v51, %v478_v52 }
 0x697   :  { %v480_v55 = vpop.permute.xlu1 %479 }
 0x698   :  { %v484_v56 = vmul.f32 %v1583_v54, %v480_v55  ;;  %487 = vrot.lane.b32.xlu0 %v483_v53, %s1694_s7 }
 0x69a   :  { %489 = vrot.lane.b32.xlu1 %v484_v56, %s1694_s7 }
 0x70a   :  { %v488_v57 = vpop.permute.xlu0 %487 }
 0x70b   :  { %v493_v58 = vadd.f32 %v488_v57, %v454_v38 }
 0x70c   :  { %v490_v59 = vpop.permute.xlu1 %489 }
 0x70d   :  { %1584 = vtanh.f32 %v493_v58  ;;  %v494_v60 = vadd.f32 %v490_v59, %v455_v40 }
 0x70f   :  { %1586 = vtanh.f32 %v494_v60 }
 0x71a   :  { %v1585_v61 = vpop.eup %1584 }
 0x71b   :  { %501 = vrot.lane.b32.xlu0 %v1585_v61, %s1696_s12 }
 0x71c   :  { %v1587_v62 = vpop.eup %1586 }
 0x71d   :  { %503 = vrot.lane.b32.xlu1 %v1587_v62, %s1696_s12 }
 0x78d   :  { %v502_v63 = vpop.permute.xlu0 %501 }
 0x78e   :  { %v507_v9 = vmul.f32 %v502_v63, %v497_v3 }
 0x78f   :  { %v504_v7 = vpop.permute.xlu1 %503 }
 0x790   :  { %v508_v11 = vmul.f32 %v504_v7, %v498_v4  ;;  %v1884_v14 = vadd.f32 %v509_v12, %v507_v9  ;;  %v780_v7 = vld [vmem:[%s2160_s0 + $0x4] sm:$0x1] }
 0x792   :  { %v1882_v13 = vadd.f32 %v510_v10, %v508_v11  ;;  %v781_v10 = vld [vmem:[%s2160_s0 + $0xc] sm:$0x1] }
 0x794   :  { %v541_v15 = vrot.slane %v1882_v13, 7 }
 0x796   :  { %v542_v16 = vsel %vm215_vm3, %v541_v15, %v1884_v14 }
 0x797   :  { %543 = vrot.lane.b32.xlu1 %v542_v16, %s1696_s12 }
 0x809   :  { %v544_v17 = vpop.permute.xlu1 %543 }
 0x80a   :  { %1497 = vmatmul.mubr.msk.f32.vlgmr.msra.gmra.mxu1 %vm37_vm2, %v544_v17 }
 0x80b   :  { %1511 = vmatpush3.msra.mxu1 %v1739_v0  ;;  %1518 = vmatprep.mubr.msk.f32.mxu1 %vm1693_vm1, %v1692_v1 }
 0x80c   :  { %1512 = vmatprep.subr.mxu1 %v1692_v1 }
 0x80d   :  { %1513 = vmatpush3.msra.mxu1 %v1745_v2 }
 0x80e   :  { %1514 = vmatprep.subr.mxu1 %v1692_v1 }
 0x80f   :  { %1515 = vmatpush3.msra.mxu1 %v1762_v5 }
 0x810   :  { %1516 = vmatprep.subr.mxu1 %v1692_v1 }
 0x811   :  { %1517 = vmatpush3.msra.mxu1 %v1771_v6 }
 0x812   :  { %1532 = vmatprep.subr.mxu1 %v1692_v1 }
 0x8ca   :  { %v613_v18 = vpop.f32.mrf.mxu1 }
 0x8cb   :  { %v637_v19 = vadd.f32 %v613_v18, %v1797_v8  ;;  %v620_v23 = vrot.slane %v613_v18, 1  ;;  %v623_v25 = vadd.f32 %v617_v22, %v613_v18 }
 0x8cc   :  { %v1498_v20 = vpop.f32.mrf.mxu1 }
 0x8cd   :  { %640 = vrot.lane.b32.xlu1 %v637_v19, %s1694_s7  ;;  %v639_v21 = vrot.slane %v637_v19, 1  ;;  %v624_v26 = vadd.f32 %v620_v23, %v618_v24  ;;  %v1401_v27 = vmul.f32 -1.442695, %v623_v25 }
 0x8cf   :  { %642 = vrot.lane.b32.xlu0 %v639_v21, %s1694_s7  ;;  %v1402_v28 = vmul.f32 -1.442695, %v624_v26  ;;  %1588 = vpow2.f32 %v1401_v27 }
 0x8d1   :  { %1590 = vpow2.f32 %v1402_v28 }
 0x8dc   :  { %v1589_v31 = vpop.eup %1588 }
 0x8dd   :  { %v631_v33 = vadd.f32 1.0, %v1589_v31 }
 0x8de   :  { %v1591_v32 = vpop.eup %1590 }
 0x8df   :  { %v632_v34 = vadd.f32 1.0, %v1591_v32  ;;  %1592 = vrcp.f32 %v631_v33 }
 0x8e1   :  { %1594 = vrcp.f32 %v632_v34 }
 0x8ec   :  { %v1593_v35 = vpop.eup %1592 }
 0x8ed   :  { %v660_v50 = vsub.f32 1.0, %v1593_v35  ;;  %v672_v56 = vmul.f32 %v1593_v35, %v1884_v14 }
 0x8ee   :  { %v1595_v38 = vpop.eup %1594 }
 0x8ef   :  { %v661_v51 = vsub.f32 1.0, %v1595_v38  ;;  %v673_v54 = vmul.f32 %v1595_v38, %v1882_v13 }
 0x93f   :  { %v641_v36 = vpop.permute.xlu1 %640 }
 0x940   :  { %v646_v37 = vmul.f32 %v1593_v35, %v641_v36 }
 0x941   :  { %v643_v39 = vpop.permute.xlu0 %642 }
 0x942   :  { %v647_v40 = vmul.f32 %v1595_v38, %v643_v39  ;;  %650 = vrot.lane.b32.xlu1 %v646_v37, %s1694_s7 }
 0x944   :  { %652 = vrot.lane.b32.xlu0 %v647_v40, %s1694_s7 }
 0x9b4   :  { %v651_v41 = vpop.permute.xlu1 %650 }
 0x9b5   :  { %v656_v42 = vadd.f32 %v651_v41, %v617_v22 }
 0x9b6   :  { %v653_v44 = vpop.permute.xlu0 %652 }
 0x9b7   :  { %1596 = vtanh.f32 %v656_v42  ;;  %v657_v45 = vadd.f32 %v653_v44, %v618_v24 }
 0x9b9   :  { %1598 = vtanh.f32 %v657_v45 }
 0x9c4   :  { %v1597_v46 = vpop.eup %1596 }
 0x9c5   :  { %664 = vrot.lane.b32.xlu1 %v1597_v46, %s1696_s12 }
 0x9c6   :  { %v1599_v47 = vpop.eup %1598 }
 0x9c7   :  { %666 = vrot.lane.b32.xlu0 %v1599_v47, %s1696_s12 }
 0xa37   :  { %v665_v49 = vpop.permute.xlu1 %664 }
 0xa38   :  { %v670_v53 = vmul.f32 %v665_v49, %v660_v50 }
 0xa39   :  { %v667_v52 = vpop.permute.xlu0 %666 }
 0xa3a   :  { %v671_v55 = vmul.f32 %v667_v52, %v661_v51  ;;  %v1918_v58 = vadd.f32 %v672_v56, %v670_v53 }
 0xa3c   :  { %v1916_v57 = vadd.f32 %v673_v54, %v671_v55 }
 0xa3e   :  { %v704_v59 = vrot.slane %v1916_v57, 7 }
 0xa40   :  { %v705_v60 = vsel %vm215_vm3, %v704_v59, %v1918_v58 }
 0xa41   :  { %706 = vrot.lane.b32.xlu0 %v705_v60, %s1696_s12 }
 0xab3   :  { %v707_v61 = vpop.permute.xlu0 %706 }
 0xab4   :  { %1508 = vmatmul.mubr.msk.f32.vlgmr.msra.gmra.mxu0 %vm37_vm2, %v707_v61 }
 0xab5   :  { %1522 = vmatpush3.msra.mxu0 %v1739_v0  ;;  %1529 = vmatprep.mubr.msk.f32.mxu0 %vm1693_vm1, %v1692_v1 }
 0xab6   :  { %1523 = vmatprep.subr.mxu0 %v1692_v1 }
 0xab7   :  { %1524 = vmatpush3.msra.mxu0 %v1745_v2 }
 0xab8   :  { %1525 = vmatprep.subr.mxu0 %v1692_v1 }
 0xab9   :  { %1526 = vmatpush3.msra.mxu0 %v1762_v5 }
 0xaba   :  { %1527 = vmatprep.subr.mxu0 %v1692_v1 }
 0xabb   :  { %1528 = vmatpush3.msra.mxu0 %v1771_v6 }
 0xb74   :  { %v776_v62 = vpop.f32.mrf.mxu0 }
 0xb75   :  { %v800_v63 = vadd.f32 %v776_v62, %v1797_v8  ;;  %v783_v9 = vrot.slane %v776_v62, 1  ;;  %v786_v11 = vadd.f32 %v780_v7, %v776_v62 }
 0xb76   :  { %v1509_v3 = vpop.f32.mrf.mxu0 }
 0xb77   :  { %803 = vrot.lane.b32.xlu0 %v800_v63, %s1694_s7  ;;  %v802_v4 = vrot.slane %v800_v63, 1  ;;  %v787_v12 = vadd.f32 %v783_v9, %v781_v10  ;;  %v1404_v15 = vmul.f32 -1.442695, %v786_v11 }
 0xb79   :  { %805 = vrot.lane.b32.xlu1 %v802_v4, %s1694_s7  ;;  %v1405_v16 = vmul.f32 -1.442695, %v787_v12  ;;  %1600 = vpow2.f32 %v1404_v15 }
 0xb7b   :  { %1602 = vpow2.f32 %v1405_v16 }
 0xb86   :  { %v1601_v17 = vpop.eup %1600 }
 0xb87   :  { %v794_v19 = vadd.f32 1.0, %v1601_v17 }
 0xb88   :  { %v1603_v18 = vpop.eup %1602 }
 0xb89   :  { %v795_v20 = vadd.f32 1.0, %v1603_v18  ;;  %1604 = vrcp.f32 %v794_v19 }
 0xb8b   :  { %1606 = vrcp.f32 %v795_v20 }
 0xb96   :  { %v1605_v21 = vpop.eup %1604 }
 0xb97   :  { %v823_v36 = vsub.f32 1.0, %v1605_v21  ;;  %v835_v42 = vmul.f32 %v1605_v21, %v1918_v58 }
 0xb98   :  { %v1607_v24 = vpop.eup %1606 }
 0xb99   :  { %v824_v37 = vsub.f32 1.0, %v1607_v24  ;;  %v836_v40 = vmul.f32 %v1607_v24, %v1916_v57 }
 0xbe9   :  { %v804_v22 = vpop.permute.xlu0 %803 }
 0xbea   :  { %v809_v23 = vmul.f32 %v1605_v21, %v804_v22 }
 0xbeb   :  { %v806_v25 = vpop.permute.xlu1 %805 }
 0xbec   :  { %v810_v26 = vmul.f32 %v1607_v24, %v806_v25  ;;  %813 = vrot.lane.b32.xlu0 %v809_v23, %s1694_s7 }
 0xbee   :  { %815 = vrot.lane.b32.xlu1 %v810_v26, %s1694_s7 }
 0xc5e   :  { %v814_v27 = vpop.permute.xlu0 %813 }
 0xc5f   :  { %v819_v28 = vadd.f32 %v814_v27, %v780_v7 }
 0xc60   :  { %v816_v31 = vpop.permute.xlu1 %815 }
 0xc61   :  { %1608 = vtanh.f32 %v819_v28  ;;  %v820_v32 = vadd.f32 %v816_v31, %v781_v10 }
 0xc63   :  { %1610 = vtanh.f32 %v820_v32 }
 0xc6e   :  { %v1609_v33 = vpop.eup %1608 }
 0xc6f   :  { %827 = vrot.lane.b32.xlu0 %v1609_v33, %s1696_s12 }
 0xc70   :  { %v1611_v34 = vpop.eup %1610 }
 0xc71   :  { %829 = vrot.lane.b32.xlu1 %v1611_v34, %s1696_s12 }
 0xce1   :  { %v828_v35 = vpop.permute.xlu0 %827 }
 0xce2   :  { %v833_v39 = vmul.f32 %v828_v35, %v823_v36 }
 0xce3   :  { %v830_v38 = vpop.permute.xlu1 %829 }
 0xce4   :  { %v834_v41 = vmul.f32 %v830_v38, %v824_v37  ;;  %v1951_v45 = vadd.f32 %v835_v42, %v833_v39  ;;  %v1106_v37 = vld [vmem:[%s2160_s0 + $0x6] sm:$0x1]  ;;  %v1107_v39 = vld [vmem:[%s2160_s0 + $0xe] sm:$0x1] }
 0xce6   :  { %v1949_v44 = vadd.f32 %v836_v40, %v834_v41 }
 0xce8   :  { %v867_v46 = vrot.slane %v1949_v44, 7 }
 0xcea   :  { %v868_v47 = vsel %vm215_vm3, %v867_v46, %v1951_v45 }
 0xceb   :  { %869 = vrot.lane.b32.xlu1 %v868_v47, %s1696_s12 }
 0xd5d   :  { %v870_v49 = vpop.permute.xlu1 %869 }
 0xd5e   :  { %1519 = vmatmul.mubr.msk.f32.vlgmr.msra.gmra.mxu1 %vm37_vm2, %v870_v49 }
 0xd5f   :  { %1533 = vmatpush3.msra.mxu1 %v1739_v0  ;;  %1540 = vmatprep.mubr.msk.f32.mxu1 %vm1693_vm1, %v1692_v1 }
 0xd60   :  { %1534 = vmatprep.subr.mxu1 %v1692_v1 }
 0xd61   :  { %1535 = vmatpush3.msra.mxu1 %v1745_v2  ;;  %v943_v2 = vld [vmem:[%s2160_s0 + $0x5] sm:$0x1] }
 0xd62   :  { %1536 = vmatprep.subr.mxu1 %v1692_v1 }
 0xd63   :  { %1537 = vmatpush3.msra.mxu1 %v1762_v5 }
 0xd64   :  { %1538 = vmatprep.subr.mxu1 %v1692_v1  ;;  %v944_v1 = vld [vmem:[%s2160_s0 + $0xd] sm:$0x1] }
 0xd65   :  { %1539 = vmatpush3.msra.mxu1 %v1771_v6 }
 0xe1e   :  { %v939_v50 = vpop.f32.mrf.mxu1 }
 0xe1f   :  { %v963_v51 = vadd.f32 %v939_v50, %v1797_v8  ;;  %v946_v53 = vrot.slane %v939_v50, 1  ;;  %v949_v5 = vadd.f32 %v943_v2, %v939_v50 }
 0xe20   :  { %v1520_v52 = vpop.f32.mrf.mxu1 }
 0xe21   :  { %966 = vrot.lane.b32.xlu1 %v963_v51, %s1694_s7  ;;  %v965_v0 = vrot.slane %v963_v51, 1  ;;  %v950_v6 = vadd.f32 %v946_v53, %v944_v1  ;;  %v1407_v54 = vmul.f32 -1.442695, %v949_v5 }
 0xe23   :  { %968 = vrot.lane.b32.xlu0 %v965_v0, %s1694_s7  ;;  %v1408_v55 = vmul.f32 -1.442695, %v950_v6  ;;  %1612 = vpow2.f32 %v1407_v54 }
 0xe25   :  { %1614 = vpow2.f32 %v1408_v55 }
 0xe30   :  { %v1613_v56 = vpop.eup %1612 }
 0xe31   :  { %v957_v60 = vadd.f32 1.0, %v1613_v56 }
 0xe32   :  { %v1615_v59 = vpop.eup %1614 }
 0xe33   :  { %v958_v61 = vadd.f32 1.0, %v1615_v59  ;;  %1616 = vrcp.f32 %v957_v60 }
 0xe35   :  { %1618 = vrcp.f32 %v958_v61 }
 0xe40   :  { %v1617_v62 = vpop.eup %1616 }
 0xe41   :  { %v986_v19 = vsub.f32 1.0, %v1617_v62  ;;  %v998_v25 = vmul.f32 %v1617_v62, %v1951_v45 }
 0xe42   :  { %v1619_v4 = vpop.eup %1618 }
 0xe43   :  { %v987_v20 = vsub.f32 1.0, %v1619_v4  ;;  %v999_v23 = vmul.f32 %v1619_v4, %v1949_v44 }
 0xe93   :  { %v967_v63 = vpop.permute.xlu1 %966 }
 0xe94   :  { %v972_v3 = vmul.f32 %v1617_v62, %v967_v63 }
 0xe95   :  { %v969_v7 = vpop.permute.xlu0 %968 }
 0xe96   :  { %v973_v9 = vmul.f32 %v1619_v4, %v969_v7  ;;  %976 = vrot.lane.b32.xlu1 %v972_v3, %s1694_s7 }
 0xe98   :  { %978 = vrot.lane.b32.xlu0 %v973_v9, %s1694_s7 }
 0xf08   :  { %v977_v10 = vpop.permute.xlu1 %976 }
 0xf09   :  { %v982_v11 = vadd.f32 %v977_v10, %v943_v2 }
 0xf0a   :  { %v979_v12 = vpop.permute.xlu0 %978 }
 0xf0b   :  { %1620 = vtanh.f32 %v982_v11  ;;  %v983_v15 = vadd.f32 %v979_v12, %v944_v1 }
 0xf0d   :  { %1622 = vtanh.f32 %v983_v15 }
 0xf18   :  { %v1621_v16 = vpop.eup %1620 }
 0xf19   :  { %990 = vrot.lane.b32.xlu1 %v1621_v16, %s1696_s12 }
 0xf1a   :  { %v1623_v17 = vpop.eup %1622 }
 0xf1b   :  { %992 = vrot.lane.b32.xlu0 %v1623_v17, %s1696_s12 }
 0xf8b   :  { %v991_v18 = vpop.permute.xlu1 %990 }
 0xf8c   :  { %v996_v22 = vmul.f32 %v991_v18, %v986_v19 }
 0xf8d   :  { %v993_v21 = vpop.permute.xlu0 %992 }
 0xf8e   :  { %v997_v24 = vmul.f32 %v993_v21, %v987_v20  ;;  %v1984_v27 = vadd.f32 %v998_v25, %v996_v22  ;;  %v1269_v22 = vld [vmem:[%s2160_s0 + $0x7] sm:$0x1] }
 0xf90   :  { %v1982_v26 = vadd.f32 %v999_v23, %v997_v24  ;;  %v1270_v24 = vld [vmem:[%s2160_s0 + $0xf] sm:$0x1] }
 0xf92   :  { %v1030_v28 = vrot.slane %v1982_v26, 7 }
 0xf94   :  { %v1031_v31 = vsel %vm215_vm3, %v1030_v28, %v1984_v27 }
 0xf95   :  { %1032 = vrot.lane.b32.xlu0 %v1031_v31, %s1696_s12 }
0x1007   :  { %v1033_v32 = vpop.permute.xlu0 %1032 }
0x1008   :  { %1530 = vmatmul.mubr.msk.f32.vlgmr.msra.gmra.mxu0 %vm37_vm2, %v1033_v32 }
0x10c8   :  { %v1102_v33 = vpop.f32.mrf.mxu0 }
0x10c9   :  { %v1126_v34 = vadd.f32 %v1102_v33, %v1797_v8  ;;  %v1109_v38 = vrot.slane %v1102_v33, 1  ;;  %v1112_v40 = vadd.f32 %v1106_v37, %v1102_v33 }
0x10ca   :  { %v1531_v35 = vpop.f32.mrf.mxu0 }
0x10cb   :  { %1129 = vrot.lane.b32.xlu0 %v1126_v34, %s1694_s7  ;;  %v1128_v36 = vrot.slane %v1126_v34, 1  ;;  %v1113_v41 = vadd.f32 %v1109_v38, %v1107_v39  ;;  %v1410_v42 = vmul.f32 -1.442695, %v1112_v40 }
0x10cd   :  { %1131 = vrot.lane.b32.xlu1 %v1128_v36, %s1694_s7  ;;  %v1411_v46 = vmul.f32 -1.442695, %v1113_v41  ;;  %1624 = vpow2.f32 %v1410_v42  ;;  %v186_v42 = vld [vmem:[%s2161_s1 + $0x8] sm:$0x1] }
0x10cf   :  { %1626 = vpow2.f32 %v1411_v46  ;;  %v185_v46 = vld [vmem:[%s2161_s1] sm:$0x1] }
0x10da   :  { %v1625_v47 = vpop.eup %1624 }
0x10db   :  { %v1120_v50 = vadd.f32 1.0, %v1625_v47  ;;  %v351_v47 = vld [vmem:[%s2161_s1 + $0x9] sm:$0x1] }
0x10dc   :  { %v1627_v49 = vpop.eup %1626 }
0x10dd   :  { %v1121_v51 = vadd.f32 1.0, %v1627_v49  ;;  %1628 = vrcp.f32 %v1120_v50  ;;  %v350_v49 = vld [vmem:[%s2161_s1 + $0x1] sm:$0x1]  ;;  %v514_v50 = vld [vmem:[%s2161_s1 + $0xa] sm:$0x1] }
0x10df   :  { %1630 = vrcp.f32 %v1121_v51  ;;  %v513_v51 = vld [vmem:[%s2161_s1 + $0x2] sm:$0x1] }
0x10ea   :  { %v1629_v52 = vpop.eup %1628 }
0x10eb   :  { %v1149_v62 = vsub.f32 1.0, %v1629_v52  ;;  %v1161_v10 = vmul.f32 %v1629_v52, %v1984_v27 }
0x10ec   :  { %v1631_v53 = vpop.eup %1630 }
0x10ed   :  { %v1150_v63 = vsub.f32 1.0, %v1631_v53  ;;  %v1162_v7 = vmul.f32 %v1631_v53, %v1982_v26 }
0x113d   :  { %v1130_v0 = vpop.permute.xlu0 %1129 }
0x113e   :  { %v1135_v2 = vmul.f32 %v1629_v52, %v1130_v0  ;;  %v677_v52 = vld [vmem:[%s2161_s1 + $0xb] sm:$0x1]  ;;  %v676_v0 = vld [vmem:[%s2161_s1 + $0x3] sm:$0x1] }
0x113f   :  { %v1132_v1 = vpop.permute.xlu1 %1131 }
0x1140   :  { %v1136_v5 = vmul.f32 %v1631_v53, %v1132_v1  ;;  %1139 = vrot.lane.b32.xlu0 %v1135_v2, %s1694_s7  ;;  %v840_v2 = vld [vmem:[%s2161_s1 + $0xc] sm:$0x1]  ;;  %v839_v53 = vld [vmem:[%s2161_s1 + $0x4] sm:$0x1]  ;;  %v1003_v1 = vld [vmem:[%s2161_s1 + $0xd] sm:$0x1] }
0x1142   :  { %1141 = vrot.lane.b32.xlu1 %v1136_v5, %s1694_s7  ;;  %v1002_v5 = vld [vmem:[%s2161_s1 + $0x5] sm:$0x1] }
0x11b2   :  { %v1140_v6 = vpop.permute.xlu0 %1139 }
0x11b3   :  { %v1145_v54 = vadd.f32 %v1140_v6, %v1106_v37 }
0x11b4   :  { %v1142_v55 = vpop.permute.xlu1 %1141 }
0x11b5   :  { %1632 = vtanh.f32 %v1145_v54  ;;  %v1146_v56 = vadd.f32 %v1142_v55, %v1107_v39 }
0x11b7   :  { %1634 = vtanh.f32 %v1146_v56 }
0x11c2   :  { %v1633_v59 = vpop.eup %1632 }
0x11c3   :  { %1153 = vrot.lane.b32.xlu0 %v1633_v59, %s1696_s12 }
0x11c4   :  { %v1635_v60 = vpop.eup %1634 }
0x11c5   :  { %1155 = vrot.lane.b32.xlu1 %v1635_v60, %s1696_s12 }
0x1235   :  { %v1154_v61 = vpop.permute.xlu0 %1153 }
0x1236   :  { %v1159_v4 = vmul.f32 %v1154_v61, %v1149_v62 }
0x1237   :  { %v1156_v3 = vpop.permute.xlu1 %1155 }
0x1238   :  { %v1160_v9 = vmul.f32 %v1156_v3, %v1150_v63  ;;  %v2008_v12 = vadd.f32 %v1161_v10, %v1159_v4  ;;  %v1166_v63 = vld [vmem:[%s2161_s1 + $0xe] sm:$0x1]  ;;  %v1165_v4 = vld [vmem:[%s2161_s1 + $0x6] sm:$0x1]  ;;  %v1328_v10 = vld [vmem:[%s2161_s1 + $0x7] sm:$0x1] }
0x123a   :  { %v2006_v11 = vadd.f32 %v1162_v7, %v1160_v9  ;;  %v1329_v9 = vld [vmem:[%s2161_s1 + $0xf] sm:$0x1]  ;;  %s1697_s1 = smov [#allocation3]  }
0x123c   :  { %v1193_v15 = vrot.slane %v2006_v11, 7 }
0x123e   :  { %v1194_v16 = vsel %vm215_vm3, %v1193_v15, %v2008_v12 }
0x123f   :  { %1195 = vrot.lane.b32.xlu1 %v1194_v16, %s1696_s12 }
0x12b1   :  { %v1196_v17 = vpop.permute.xlu1 %1195 }
0x12b2   :  { %1541 = vmatmul.mubr.msk.f32.vlgmr.msra.gmra.mxu1 %vm37_vm2, %v1196_v17 }
0x1372   :  { %v1265_v18 = vpop.f32.mrf.mxu1 }
0x1373   :  { %v1289_v19 = vadd.f32 %v1265_v18, %v1797_v8  ;;  %v1272_v23 = vrot.slane %v1265_v18, 1  ;;  %v1275_v25 = vadd.f32 %v1269_v22, %v1265_v18 }
0x1374   :  { %v1542_v20 = vpop.f32.mrf.mxu1 }
0x1375   :  { %1292 = vrot.lane.b32.xlu1 %v1289_v19, %s1694_s7  ;;  %v1291_v21 = vrot.slane %v1289_v19, 1  ;;  %v1276_v28 = vadd.f32 %v1272_v23, %v1270_v24  ;;  %v1413_v31 = vmul.f32 -1.442695, %v1275_v25 }
0x1377   :  { %1294 = vrot.lane.b32.xlu0 %v1291_v21, %s1694_s7  ;;  %v1414_v32 = vmul.f32 -1.442695, %v1276_v28  ;;  %1636 = vpow2.f32 %v1413_v31 }
0x1379   :  { %1638 = vpow2.f32 %v1414_v32 }
0x1384   :  { %v1637_v8 = vpop.eup %1636 }
0x1385   :  { %v1283_v34 = vadd.f32 1.0, %v1637_v8 }
0x1386   :  { %v1639_v33 = vpop.eup %1638 }
0x1387   :  { %v1284_v35 = vadd.f32 1.0, %v1639_v33  ;;  %1640 = vrcp.f32 %v1283_v34 }
0x1389   :  { %1642 = vrcp.f32 %v1284_v35 }
0x1394   :  { %v2024_v36 = vpop.eup %1640 }
0x1395   :  { %v1312_v8 = vsub.f32 1.0, %v2024_v36 }
0x1396   :  { %v2027_v39 = vpop.eup %1642 }
0x13e7   :  { %v1293_v37 = vpop.permute.xlu1 %1292 }
0x13e8   :  { %v1298_v38 = vmul.f32 %v2024_v36, %v1293_v37 }
0x13e9   :  { %v1295_v40 = vpop.permute.xlu0 %1294 }
0x13ea   :  { %v1299_v41 = vmul.f32 %v2027_v39, %v1295_v40  ;;  %1302 = vrot.lane.b32.xlu1 %v1298_v38, %s1694_s7  ;;  %v1324_v40 = vmul.f32 %v2024_v36, %v2008_v12 }
0x13ec   :  { %1304 = vrot.lane.b32.xlu0 %v1299_v41, %s1694_s7 }
0x13ee   :  { %191 = vrot.lane.b32.xlu1 %v186_v42, %s1695_s11 }
0x13f0   :  { %189 = vrot.lane.b32.xlu0 %v185_v46, %s1695_s11 }
0x13f2   :  { %356 = vrot.lane.b32.xlu1 %v351_v47, %s1695_s11 }
0x13f4   :  { %354 = vrot.lane.b32.xlu0 %v350_v49, %s1695_s11 }
0x13f6   :  { %519 = vrot.lane.b32.xlu1 %v514_v50, %s1695_s11 }
0x13f8   :  { %517 = vrot.lane.b32.xlu0 %v513_v51, %s1695_s11 }
0x13fa   :  { %682 = vrot.lane.b32.xlu1 %v677_v52, %s1695_s11 }
0x13fc   :  { %680 = vrot.lane.b32.xlu0 %v676_v0, %s1695_s11 }
0x13fe   :  { %845 = vrot.lane.b32.xlu1 %v840_v2, %s1695_s11 }
0x1400   :  { %843 = vrot.lane.b32.xlu0 %v839_v53, %s1695_s11 }
0x1402   :  { %1008 = vrot.lane.b32.xlu1 %v1003_v1, %s1695_s11 }
0x1404   :  { %1006 = vrot.lane.b32.xlu0 %v1002_v5, %s1695_s11 }
0x145c   :  { %v1303_v6 = vpop.permute.xlu1 %1302 }
0x145d   :  { %v1308_v54 = vadd.f32 %v1303_v6, %v1269_v22 }
0x145e   :  { %v1305_v55 = vpop.permute.xlu0 %1304 }
0x145f   :  { %1644 = vtanh.f32 %v1308_v54  ;;  %v1309_v56 = vadd.f32 %v1305_v55, %v1270_v24 }
0x1460   :  { %v192_v59 = vpop.permute.xlu1 %191 }
0x1461   :  { %1646 = vtanh.f32 %v1309_v56  ;;  %v196_v16 = vmul.f32 %v192_v59, %v1814_v43 }
0x1462   :  { %v190_v61 = vpop.permute.xlu0 %189 }
0x1463   :  { %v195_v18 = vmul.f32 %v190_v61, %v1816_v48 }
0x1464   :  { %v357_v3 = vpop.permute.xlu1 %356 }
0x1465   :  { %v361_v19 = vmul.f32 %v357_v3, %v1848_v29 }
0x1466   :  { %v355_v7 = vpop.permute.xlu0 %354 }
0x1467   :  { %v360_v21 = vmul.f32 %v355_v7, %v1850_v30 }
0x1468   :  { %v520_v15 = vpop.permute.xlu1 %519 }
0x1469   :  { %v524_v23 = vmul.f32 %v520_v15, %v1882_v13 }
0x146a   :  { %v518_v17 = vpop.permute.xlu0 %517 }
0x146b   :  { %v523_v43 = vmul.f32 %v518_v17, %v1884_v14 }
0x146c   :  { %v1645_v60 = vpop.eup %1644  ;;  %v683_v20 = vpop.permute.xlu1 %682 }
0x146d   :  { %1316 = vrot.lane.b32.xlu1 %v1645_v60, %s1696_s12  ;;  %v687_v24 = vmul.f32 %v683_v20, %v1916_v57 }
0x146e   :  { %v1647_v62 = vpop.eup %1646  ;;  %v681_v22 = vpop.permute.xlu0 %680 }
0x146f   :  { %1318 = vrot.lane.b32.xlu0 %v1647_v62, %s1696_s12  ;;  %v686_v25 = vmul.f32 %v681_v22, %v1918_v58 }
0x1470   :  { %v846_v48 = vpop.permute.xlu1 %845 }
0x1471   :  { %1171 = vrot.lane.b32.xlu1 %v1166_v63, %s1695_s11  ;;  %v850_v30 = vmul.f32 %v846_v48, %v1949_v44  ;;  %v1313_v44 = vsub.f32 1.0, %v2027_v39 }
0x1472   :  { %v844_v29 = vpop.permute.xlu0 %843 }
0x1473   :  { %1169 = vrot.lane.b32.xlu0 %v1165_v4, %s1695_s11  ;;  %v849_v28 = vmul.f32 %v844_v29, %v1951_v45 }
0x1474   :  { %v1009_v13 = vpop.permute.xlu1 %1008 }
0x1475   :  { %1334 = vrot.lane.b32.xlu1 %v1329_v9, %s1695_s11  ;;  %v1013_v31 = vmul.f32 %v1009_v13, %v1982_v26  ;;  %v1325_v26 = vmul.f32 %v2027_v39, %v2006_v11 }
0x1476   :  { %v1007_v14 = vpop.permute.xlu0 %1006 }
0x1477   :  { %1332 = vrot.lane.b32.xlu0 %v1328_v10, %s1695_s11  ;;  %v1012_v57 = vmul.f32 %v1007_v14, %v1984_v27  ;;  %s1365_s11 = sshll.u32 %s1697_s1, 4  ;;  %s1366_s11 = int_to_ptr.vmem [resolvable:$true] %s1365_s11 }
0x1478   :  { %s1648_s23 = scalar_lea.vmem %s1366_s11, 256  ;;  %p1653_p1 = scmp.lt.s32.totalorder %s1366_s11, %s1366_s11 }
0x1479   :  { %201 = vrot.lane.b32.xlu1 %v196_v16, %s1696_s12  ;;  %p1649_p0 = scmp.ne.s32.totalorder %s1366_s11, %s1648_s23  ;;  %p1654_p2 = scmp.lt.s32.totalorder %s1648_s23, %s1648_s23 }
0x147b   :  { %199 = vrot.lane.b32.xlu0 %v195_v18, %s1696_s12  ;;  %p1655_p3 = por %p1654_p2, %p1653_p1 }
0x147d   :  { %366 = vrot.lane.b32.xlu1 %v361_v19, %s1696_s12  ;;  %p1656_p4 = pnand %p1655_p3, %p1649_p0 }
0x147f   :  { %364 = vrot.lane.b32.xlu0 %v360_v21, %s1696_s12 }
0x1481   :  { %529 = vrot.lane.b32.xlu1 %v524_v23, %s1696_s12 }
0x1483   :  { %527 = vrot.lane.b32.xlu0 %v523_v43, %s1696_s12 }
0x1485   :  { %692 = vrot.lane.b32.xlu1 %v687_v24, %s1696_s12 }
0x1487   :  { %690 = vrot.lane.b32.xlu0 %v686_v25, %s1696_s12 }
0x1489   :  { %855 = vrot.lane.b32.xlu1 %v850_v30, %s1696_s12 }
0x148b   :  { %853 = vrot.lane.b32.xlu0 %v849_v28, %s1696_s12 }
0x148d   :  { %1018 = vrot.lane.b32.xlu1 %v1013_v31, %s1696_s12 }
0x148f   :  { %1016 = vrot.lane.b32.xlu0 %v1012_v57, %s1696_s12 }
0x14df   :  { %v1317_v58 = vpop.permute.xlu1 %1316 }
0x14e0   :  { %v1322_v34 = vmul.f32 %v1317_v58, %v1312_v8 }
0x14e1   :  { %v1319_v32 = vpop.permute.xlu0 %1318 }
0x14e2   :  { %v1323_v45 = vmul.f32 %v1319_v32, %v1313_v44  ;;  %v1326_v46 = vadd.f32 %v1324_v40, %v1322_v34 }
0x14e3   :  { %v1172_v33 = vpop.permute.xlu1 %1171 }
0x14e4   :  { %v1176_v35 = vmul.f32 %v1172_v33, %v2006_v11  ;;  %v1327_v38 = vadd.f32 %v1325_v26, %v1323_v45 }
0x14e5   :  { %v1170_v37 = vpop.permute.xlu0 %1169 }
0x14e6   :  { %v1175_v27 = vmul.f32 %v1170_v37, %v2008_v12  ;;  %1181 = vrot.lane.b32.xlu1 %v1176_v35, %s1696_s12  ;;  %v1352_v11 = vrot.slane %v1327_v38, 7 }
0x14e7   :  { %v1335_v41 = vpop.permute.xlu1 %1334 }
0x14e8   :  { %v1339_v42 = vmul.f32 %v1335_v41, %v1327_v38  ;;  %1179 = vrot.lane.b32.xlu0 %v1175_v27, %s1696_s12  ;;  %v1353_v36 = vsel %vm215_vm3, %v1352_v11, %v1326_v46 }
0x14e9   :  { %v1333_v47 = vpop.permute.xlu0 %1332 }
0x14ea   :  { %v1338_v49 = vmul.f32 %v1333_v47, %v1326_v46  ;;  %1344 = vrot.lane.b32.xlu1 %v1339_v42, %s1696_s12 }
0x14eb   :  { %v202_v39 = vpop.permute.xlu1 %201 }
0x14ec   :  { %207 = vst.msk [vmem:[#allocation3 + $0x8] sm:$0x1] %vm205_vm4, %v202_v39  ;;  %1342 = vrot.lane.b32.xlu0 %v1338_v49, %s1696_s12 }
0x14ed   :  { %v200_v50 = vpop.permute.xlu0 %199 }
0x14ee   :  { %206 = vst.msk [vmem:[#allocation3] sm:$0x1] %vm205_vm4, %v200_v50 }
0x14ef   :  { %v367_v12 = vpop.permute.xlu1 %366 }
0x14f0   :  { %371 = vst.msk [vmem:[#allocation3 + $0x9] sm:$0x1] %vm205_vm4, %v367_v12  ;;  %1354 = vrot.lane.b32.xlu0 %v1353_v36, %s1696_s12  ;;  %s1698_s12 = smov [#allocation5]  }
0x14f1   :  { %v365_v51 = vpop.permute.xlu0 %364  ;;  %s1378_s22 = sshll.u32 %s1698_s12, 4  ;;  %s1379_s22 = int_to_ptr.vmem [resolvable:$true] %s1378_s22 }
0x14f2   :  { %370 = vst.msk [vmem:[#allocation3 + $0x1] sm:$0x1] %vm205_vm4, %v365_v51 }
0x14f3   :  { %v530_v52 = vpop.permute.xlu1 %529 }
0x14f4   :  { %534 = vst.msk [vmem:[#allocation3 + $0xa] sm:$0x1] %vm205_vm4, %v530_v52 }
0x14f5   :  { %v528_v0 = vpop.permute.xlu0 %527 }
0x14f6   :  { %533 = vst.msk [vmem:[#allocation3 + $0x2] sm:$0x1] %vm205_vm4, %v528_v0 }
0x14f7   :  { %v693_v2 = vpop.permute.xlu1 %692 }
0x14f8   :  { %697 = vst.msk [vmem:[#allocation3 + $0xb] sm:$0x1] %vm205_vm4, %v693_v2 }
0x14f9   :  { %v691_v53 = vpop.permute.xlu0 %690 }
0x14fa   :  { %696 = vst.msk [vmem:[#allocation3 + $0x3] sm:$0x1] %vm205_vm4, %v691_v53 }
0x14fb   :  { %v856_v1 = vpop.permute.xlu1 %855 }
0x14fc   :  { %860 = vst.msk [vmem:[#allocation3 + $0xc] sm:$0x1] %vm205_vm4, %v856_v1 }
0x14fd   :  { %v854_v5 = vpop.permute.xlu0 %853 }
0x14fe   :  { %859 = vst.msk [vmem:[#allocation3 + $0x4] sm:$0x1] %vm205_vm4, %v854_v5 }
0x14ff   :  { %v1019_v6 = vpop.permute.xlu1 %1018 }
0x1500   :  { %1023 = vst.msk [vmem:[#allocation3 + $0xd] sm:$0x1] %vm205_vm4, %v1019_v6 }
0x1501   :  { %v1017_v54 = vpop.permute.xlu0 %1016 }
0x1502   :  { %1022 = vst.msk [vmem:[#allocation3 + $0x5] sm:$0x1] %vm205_vm4, %v1017_v54 }
0x1558   :  { %v1182_v55 = vpop.permute.xlu1 %1181 }
0x1559   :  { %1186 = vst.msk [vmem:[#allocation3 + $0xe] sm:$0x1] %vm205_vm4, %v1182_v55 }
0x155a   :  { %v1180_v56 = vpop.permute.xlu0 %1179 }
0x155b   :  { %1185 = vst.msk [vmem:[#allocation3 + $0x6] sm:$0x1] %vm205_vm4, %v1180_v56 }
0x155c   :  { %v1345_v59 = vpop.permute.xlu1 %1344 }
0x155d   :  { %1349 = vst.msk [vmem:[#allocation3 + $0xf] sm:$0x1] %vm205_vm4, %v1345_v59 }
0x155e   :  { %v1343_v60 = vpop.permute.xlu0 %1342 }
0x155f   :  { %1348 = vst.msk [vmem:[#allocation3 + $0x7] sm:$0x1] %vm205_vm4, %v1343_v60 }
0x1560   :  { %1659 = shalt.err (!%p1656_p4)
}
0x1561   :  { %s1699_s24 = smov 128   ;;  %s1700_s7 = smov 8  }
0x1562   :  { %1371 = dma.vmem_to_hbm [thread:$0]  %s1366_s11, 256, %s2165_s5, [#allocation4], %s1699_s24, %s1699_s24, %s1700_s7   ;;  %v1355_v61 = vpop.permute.xlu0 %1354 }
0x1563   :  { %1358 = vst.msk [vmem:[#allocation2] sm:$0x3] %vm29_vm0, %v1355_v61  ;;  %1359 = vst.msk [vmem:[#allocation5] sm:$0x3] %vm29_vm0, %v1355_v61  ;;  %s1668_s27 = scalar_lea.vmem %s1379_s22, 32  ;;  %p1673_p6 = scmp.lt.s32.totalorder %s1379_s22, %s1379_s22 }
0x1564   :  { %p1669_p5 = scmp.ne.s32.totalorder %s1379_s22, %s1668_s27  ;;  %p1674_p7 = scmp.lt.s32.totalorder %s1668_s27, %s1668_s27 }
0x1566   :  { %p1675_p8 = por %p1674_p7, %p1673_p6 }
0x1568   :  { %p1676_p9 = pnand %p1675_p8, %p1669_p5 }
0x156a   :  { %1679 = shalt.err (!%p1676_p9)
}
0x156b   :  { %1381 = dma.vmem_to_hbm [thread:$0]  %s1379_s22, 32, %s2166_s6, [#allocation6]  }
0x156c   :  { %1688 = dma.done.wait [#allocation4], 256  }
0x156d   :  { %1689 = vsyncadd [#allocation4], 4294967040 }
0x156e   :  { %1690 = dma.done.wait [#allocation6], 32  }
0x156f   :  { %1691 = vsyncadd [#allocation6], 4294967264 }
0x1570   :  { %1388 = vsyncpa [#allocation4], 1 }
0x1571   :  { %1389 = vsyncpa [#allocation6], 1 }

</bundles_post_ra>
